<compile_context>
chip_gen: v7x
topology: tpu7x:2x2x1
jax: 0.10.0
libtpu: 0.0.40
codegen_flags: <defaults>
</compile_context>

<pallas_src>
import functools

import jax
import jax.numpy as jnp
from jax.experimental import pallas as pl
from jax.experimental.pallas import tpu as pltpu


def _gat_fused_kernel(x_ref, adj_ref, w_ref, asrc_ref, adst_ref, o_ref, *,
                      num_layers, num_heads, negative_slope):
    """Single-invocation kernel: every layer/head is statically unrolled in the body."""
    adj = adj_ref[...]                        # [N, N] f32 0/1 edge mask (resident)
    w_all = w_ref[...]                        # [L*H, F] diag weights (resident)
    asrc_all = asrc_ref[...]                  # [L*H, F]
    adst_all = adst_ref[...]                  # [L*H, F]

    inv_heads = 1.0 / num_heads
    x_cur = x_ref[...]                        # [N, F] f32 current layer input (stays in VMEM)

    for l in range(num_layers):               # static unroll: no grid-step overhead
        r0 = l * num_heads
        w_l = w_all[r0:r0 + num_heads, :]             # [H, F]
        asrc_l = asrc_all[r0:r0 + num_heads, :]       # [H, F]
        # Fold the diag weight into the dst attention vectors so every head's d-scores come
        # out of ONE lane-dense [H,F] @ [N,F]^T matmul per layer (replaces H matvecs).
        dv_l = w_l * adst_all[r0:r0 + num_heads, :]   # [H, F]
        d_all = jax.lax.dot_general(                  # [H, N]; d_all[k, c] = a_dst_k . h_k[c]
            dv_l, x_cur, (((1,), (1,)), ((), ())),
            preferred_element_type=jnp.float32)

        e_blocks = []
        h_blocks = []
        for k in range(num_heads):             # static unroll
            h_feat = x_cur * w_l[k:k + 1, :]                                   # [N, F]
            # src scores: VPU mul + row reduce (kept deliberately; see header note).
            s_col = jnp.sum(h_feat * asrc_l[k:k + 1, :], axis=-1, keepdims=True)  # [N, 1]
            logits = s_col + d_all[k:k + 1, :]                                 # [N, N]

            # e = adj * exp(-leaky_relu(logits)); elementwise math stays f32.
            neg_leaky = jnp.where(logits > 0, -logits, -negative_slope * logits)
            e = jnp.exp(neg_leaky) * adj                                       # [N, N] f32
            denom = jnp.sum(e, axis=-1, keepdims=True)                         # [N, 1]
            # EUP reciprocal instead of an f32 divide; normalize BEFORE the bf16 cast so
            # MXU operands are well-conditioned values in [0, 1].
            e_norm = e * pl.reciprocal(denom, approx=True)                     # [N, N]
            e_blocks.append(e_norm.astype(jnp.bfloat16))
            h_blocks.append(h_feat.astype(jnp.bfloat16))

        # Fused head aggregation: single K = H*N bf16 matmul, f32 accumulation.
        e_cat = jnp.concatenate(e_blocks, axis=1)                              # [N, H*N]
        h_cat = jnp.concatenate(h_blocks, axis=0)                              # [H*N, F]
        head_sum = jnp.dot(e_cat, h_cat, preferred_element_type=jnp.float32)   # [N, F]
        m = head_sum * inv_heads                                               # head mean

        if l < num_layers - 1:
            x_cur = jnp.where(m > 0, m, jnp.exp(m) - 1.0)                      # ELU
        else:
            o_ref[...] = m.astype(o_ref.dtype)


def gat_forward(x, adj_mask, params, *, negative_slope=0.2):
    """Fused GAT forward: multi-head graph attention, diag weights, eval mode."""
    n, f = x.shape
    w, a_src, a_dst = params["w"], params["a_src"], params["a_dst"]
    num_layers, num_heads, _ = w.shape
    lh = num_layers * num_heads

    # Parameters as small resident 2-D arrays: row (l*H + k) holds the (layer, head) vector.
    w2 = w.reshape(lh, f)
    asrc2 = a_src.reshape(lh, f)
    adst2 = a_dst.reshape(lh, f)

    kernel = functools.partial(
        _gat_fused_kernel,
        num_layers=num_layers, num_heads=num_heads, negative_slope=negative_slope)

    flops = num_layers * (2 * n * (num_heads * n) * f     # fused e_norm @ h aggregation
                          + 2 * num_heads * n * f         # stacked dst-score matmul
                          + num_heads * 5 * n * f         # diag scale + src reduce
                          + num_heads * 6 * n * n)        # logits/leaky/mask/rowsum/normalize
    transcendentals = num_layers * num_heads * (n * n + n) + (num_layers - 1) * n * f
    bytes_accessed = (x.size + adj_mask.size + w2.size + asrc2.size + adst2.size + n * f) * 4

    return pl.pallas_call(
        kernel,
        out_shape=jax.ShapeDtypeStruct((n, f), jnp.float32),
        # No grid: one invocation; inputs/outputs are whole resident VMEM blocks.
        compiler_params=pltpu.CompilerParams(vmem_limit_bytes=32 * 1024 * 1024),
        cost_estimate=pl.CostEstimate(flops=flops, transcendentals=transcendentals,
                                      bytes_accessed=bytes_accessed),
    )(x, adj_mask.astype(jnp.float32), w2, asrc2, adst2)


def gat_reference(x, adj_mask, params, *, negative_slope=0.2, match_kernel_casts=False):
    """Pure-JAX reference of the same math (optionally mirroring the kernel's bf16 casts)."""
    w, a_src, a_dst = params["w"], params["a_src"], params["a_dst"]
    num_layers, num_heads, _ = w.shape
    h_cur = x
    for l in range(num_layers):
        acc = 0.0
        for k in range(num_heads):
            hf = h_cur * w[l, k]
            s = hf @ a_src[l, k]
            d = hf @ a_dst[l, k]
            z = s[:, None] + d[None, :]
            e = jnp.exp(jnp.where(z > 0, -z, -negative_slope * z)) * adj_mask
            denom = e.sum(-1, keepdims=True)
            if match_kernel_casts:
                en = (e / denom).astype(jnp.bfloat16)
                acc = acc + jnp.dot(en, hf.astype(jnp.bfloat16),
                                    preferred_element_type=jnp.float32)
            else:
                acc = acc + (e @ hf) / denom
        m = acc / num_heads
        if l < num_layers - 1:
            m = jnp.where(m > 0, m, jnp.exp(m) - 1.0)   # ELU (diag branch)
        h_cur = m
    return h_cur


def init_params(kw, ka, num_layers, num_heads, f):
    # diag=True => reference inits w with nn.init.ones_; a small deterministic jitter is
    # added so the numeric check actually exercises the multiply.  a_src/a_dst mirror
    # xavier_uniform(gain=1.414) on the concatenated [2F, 1] attention vector.
    jit = jax.random.uniform(kw, (num_layers, num_heads, f), jnp.float32, -0.05, 0.05)
    w = jnp.ones((num_layers, num_heads, f), jnp.float32) + jit
    bound = 1.414 * (6.0 / (2 * f + 1)) ** 0.5
    a = jax.random.uniform(ka, (num_layers, num_heads, 2 * f), jnp.float32, -bound, bound)
    return {"w": w, "a_src": a[..., :f], "a_dst": a[..., f:]}


if __name__ == "__main__":
    # GAT(n_units=[128,128,128], n_heads=[2,2], dropout=0.5, attn_dropout=0.5,
    #     instance_normalization=False, diag=True), eval mode (dropout = identity).
    # N and F chosen as 128 so rows/lanes are (8,128)-aligned and MXU tiles are full.
    N, F, HEADS, LAYERS = 128, 128, 2, 2

    key = jax.random.PRNGKey(0)
    kx, kadj, kw, ka = jax.random.split(key, 4)

    x = jax.random.normal(kx, (N, F), jnp.float32)

    # Symmetric 0/1 adjacency with self loops (dense mask; the reference uses a sparse adj
    # but only its sparsity pattern enters the attention math).
    a = (jax.random.uniform(kadj, (N, N)) > 0.7).astype(jnp.float32)
    a = jnp.maximum(a, a.T)
    adj_mask = jnp.maximum(a, jnp.eye(N, dtype=jnp.float32))

    params = init_params(kw, ka, LAYERS, HEADS, F)

    out = gat_forward(x, adj_mask, params)
    out = jax.block_until_ready(out)
    assert out.shape == (N, F)

    # 1) Tight check vs a pure-JAX reference that mirrors the kernel's bf16 casts
    #    (tolerance covers the unmirrored approx-reciprocal / MXU accumulation order).
    ref_cast = gat_reference(x, adj_mask, params, match_kernel_casts=True)
    assert jnp.allclose(out, ref_cast, atol=5e-3, rtol=5e-3)

    # 2) Loose check vs the full-f32 reference (bf16 MXU fidelity of the N^2 term).
    ref_f32 = gat_reference(x, adj_mask, params, match_kernel_casts=False)
    assert jnp.allclose(out, ref_f32, atol=5e-2, rtol=5e-2)

    print("KERNEL_OK")
</pallas_src>

<mosaic_0001>
module attributes {stable_mosaic.version = 11 : i64} {
  func.func @_gat_fused_kernel(%arg0: memref<128x128xf32, #tpu.memory_space<vmem>>, %arg1: memref<128x128xf32, #tpu.memory_space<vmem>>, %arg2: memref<4x128xf32, #tpu.memory_space<vmem>>, %arg3: memref<4x128xf32, #tpu.memory_space<vmem>>, %arg4: memref<4x128xf32, #tpu.memory_space<vmem>>, %arg5: memref<128x128xf32, #tpu.memory_space<vmem>>) attributes {dimension_semantics = [], scalar_prefetch = 0 : i64, scratch_operands = 0 : i64, tpu.core_type = #tpu.core_type<tc>} {
    %c0 = arith.constant 0 : index
    %c0_0 = arith.constant 0 : index
    %0 = vector.load %arg1[%c0, %c0_0] : memref<128x128xf32, #tpu.memory_space<vmem>>, vector<128x128xf32>
    %c0_1 = arith.constant 0 : index
    %c0_2 = arith.constant 0 : index
    %1 = vector.load %arg2[%c0_1, %c0_2] : memref<4x128xf32, #tpu.memory_space<vmem>>, vector<4x128xf32>
    %c0_3 = arith.constant 0 : index
    %c0_4 = arith.constant 0 : index
    %2 = vector.load %arg3[%c0_3, %c0_4] : memref<4x128xf32, #tpu.memory_space<vmem>>, vector<4x128xf32>
    %c0_5 = arith.constant 0 : index
    %c0_6 = arith.constant 0 : index
    %3 = vector.load %arg4[%c0_5, %c0_6] : memref<4x128xf32, #tpu.memory_space<vmem>>, vector<4x128xf32>
    %c0_7 = arith.constant 0 : index
    %c0_8 = arith.constant 0 : index
    %4 = vector.load %arg0[%c0_7, %c0_8] : memref<128x128xf32, #tpu.memory_space<vmem>>, vector<128x128xf32>
    %5 = vector.extract_strided_slice %1 {offsets = [0, 0], sizes = [2, 128], strides = [1, 1]} : vector<4x128xf32> to vector<2x128xf32>
    %6 = vector.extract_strided_slice %2 {offsets = [0, 0], sizes = [2, 128], strides = [1, 1]} : vector<4x128xf32> to vector<2x128xf32>
    %7 = vector.extract_strided_slice %3 {offsets = [0, 0], sizes = [2, 128], strides = [1, 1]} : vector<4x128xf32> to vector<2x128xf32>
    %8 = arith.mulf %5, %7 : vector<2x128xf32>
    %cst = arith.constant dense<0.000000e+00> : vector<2x128xf32>
    %9 = tpu.matmul %8, %4, %cst {dimension_numbers = #tpu.dot_dimension_numbers<[1], [1], [0], [0], [0, 0, 1, 0], [], []>} : vector<2x128xf32>, vector<128x128xf32>, vector<2x128xf32> -> vector<2x128xf32>
    %10 = vector.extract_strided_slice %5 {offsets = [0, 0], sizes = [1, 128], strides = [1, 1]} : vector<2x128xf32> to vector<1x128xf32>
    %11 = vector.broadcast %10 : vector<1x128xf32> to vector<128x128xf32>
    %12 = arith.mulf %4, %11 : vector<128x128xf32>
    %13 = vector.extract_strided_slice %6 {offsets = [0, 0], sizes = [1, 128], strides = [1, 1]} : vector<2x128xf32> to vector<1x128xf32>
    %14 = vector.broadcast %13 : vector<1x128xf32> to vector<128x128xf32>
    %15 = arith.mulf %12, %14 : vector<128x128xf32>
    %cst_9 = arith.constant dense<0.000000e+00> : vector<128xf32>
    %16 = vector.multi_reduction <add>, %15, %cst_9 [1] : vector<128x128xf32> to vector<128xf32>
    %17 = vector.shape_cast %16 : vector<128xf32> to vector<128x1xf32>
    %18 = vector.extract_strided_slice %9 {offsets = [0, 0], sizes = [1, 128], strides = [1, 1]} : vector<2x128xf32> to vector<1x128xf32>
    %19 = vector.broadcast %17 : vector<128x1xf32> to vector<128x128xf32>
    %20 = vector.broadcast %18 : vector<1x128xf32> to vector<128x128xf32>
    %21 = arith.addf %19, %20 : vector<128x128xf32>
    %cst_10 = arith.constant 0.000000e+00 : f32
    %22 = vector.broadcast %cst_10 : f32 to vector<128x128xf32>
    %23 = arith.cmpf ogt, %21, %22 : vector<128x128xf32>
    %cst_11 = arith.constant 0.000000e+00 : f32
    %24 = vector.broadcast %cst_11 : f32 to vector<128x128xf32>
    %25 = arith.subf %24, %21 : vector<128x128xf32>
    %cst_12 = arith.constant -2.000000e-01 : f32
    %26 = vector.broadcast %cst_12 : f32 to vector<128x128xf32>
    %27 = arith.mulf %26, %21 : vector<128x128xf32>
    %28 = arith.select %23, %25, %27 : vector<128x128xi1>, vector<128x128xf32>
    %29 = math.exp %28 : vector<128x128xf32>
    %30 = arith.mulf %29, %0 : vector<128x128xf32>
    %cst_13 = arith.constant dense<0.000000e+00> : vector<128xf32>
    %31 = vector.multi_reduction <add>, %30, %cst_13 [1] : vector<128x128xf32> to vector<128xf32>
    %32 = vector.shape_cast %31 : vector<128xf32> to vector<128x1xf32>
    %33 = tpu.reciprocal %32 {approx = true} : vector<128x1xf32> -> vector<128x1xf32>
    %34 = vector.broadcast %33 : vector<128x1xf32> to vector<128x128xf32>
    %35 = arith.mulf %30, %34 : vector<128x128xf32>
    %36 = arith.truncf %35 : vector<128x128xf32> to vector<128x128xbf16>
    %37 = arith.truncf %12 : vector<128x128xf32> to vector<128x128xbf16>
    %38 = vector.extract_strided_slice %5 {offsets = [1, 0], sizes = [1, 128], strides = [1, 1]} : vector<2x128xf32> to vector<1x128xf32>
    %39 = vector.broadcast %38 : vector<1x128xf32> to vector<128x128xf32>
    %40 = arith.mulf %4, %39 : vector<128x128xf32>
    %41 = vector.extract_strided_slice %6 {offsets = [1, 0], sizes = [1, 128], strides = [1, 1]} : vector<2x128xf32> to vector<1x128xf32>
    %42 = vector.broadcast %41 : vector<1x128xf32> to vector<128x128xf32>
    %43 = arith.mulf %40, %42 : vector<128x128xf32>
    %cst_14 = arith.constant dense<0.000000e+00> : vector<128xf32>
    %44 = vector.multi_reduction <add>, %43, %cst_14 [1] : vector<128x128xf32> to vector<128xf32>
    %45 = vector.shape_cast %44 : vector<128xf32> to vector<128x1xf32>
    %46 = vector.extract_strided_slice %9 {offsets = [1, 0], sizes = [1, 128], strides = [1, 1]} : vector<2x128xf32> to vector<1x128xf32>
    %47 = vector.broadcast %45 : vector<128x1xf32> to vector<128x128xf32>
    %48 = vector.broadcast %46 : vector<1x128xf32> to vector<128x128xf32>
    %49 = arith.addf %47, %48 : vector<128x128xf32>
    %cst_15 = arith.constant 0.000000e+00 : f32
    %50 = vector.broadcast %cst_15 : f32 to vector<128x128xf32>
    %51 = arith.cmpf ogt, %49, %50 : vector<128x128xf32>
    %cst_16 = arith.constant 0.000000e+00 : f32
    %52 = vector.broadcast %cst_16 : f32 to vector<128x128xf32>
    %53 = arith.subf %52, %49 : vector<128x128xf32>
    %cst_17 = arith.constant -2.000000e-01 : f32
    %54 = vector.broadcast %cst_17 : f32 to vector<128x128xf32>
    %55 = arith.mulf %54, %49 : vector<128x128xf32>
    %56 = arith.select %51, %53, %55 : vector<128x128xi1>, vector<128x128xf32>
    %57 = math.exp %56 : vector<128x128xf32>
    %58 = arith.mulf %57, %0 : vector<128x128xf32>
    %cst_18 = arith.constant dense<0.000000e+00> : vector<128xf32>
    %59 = vector.multi_reduction <add>, %58, %cst_18 [1] : vector<128x128xf32> to vector<128xf32>
    %60 = vector.shape_cast %59 : vector<128xf32> to vector<128x1xf32>
    %61 = tpu.reciprocal %60 {approx = true} : vector<128x1xf32> -> vector<128x1xf32>
    %62 = vector.broadcast %61 : vector<128x1xf32> to vector<128x128xf32>
    %63 = arith.mulf %58, %62 : vector<128x128xf32>
    %64 = arith.truncf %63 : vector<128x128xf32> to vector<128x128xbf16>
    %65 = arith.truncf %40 : vector<128x128xf32> to vector<128x128xbf16>
    %66 = tpu.concatenate %36, %64 in 1 : vector<128x128xbf16>, vector<128x128xbf16> -> vector<128x256xbf16>
    %67 = tpu.concatenate %37, %65 in 0 : vector<128x128xbf16>, vector<128x128xbf16> -> vector<256x128xbf16>
    %cst_19 = arith.constant dense<0.000000e+00> : vector<128x128xf32>
    %68 = tpu.matmul %66, %67, %cst_19 {dimension_numbers = #tpu.dot_dimension_numbers<[1], [0], [0], [1], [0, 0, 1, 1], [], []>} : vector<128x256xbf16>, vector<256x128xbf16>, vector<128x128xf32> -> vector<128x128xf32>
    %cst_20 = arith.constant 5.000000e-01 : f32
    %69 = vector.broadcast %cst_20 : f32 to vector<128x128xf32>
    %70 = arith.mulf %68, %69 : vector<128x128xf32>
    %cst_21 = arith.constant 0.000000e+00 : f32
    %71 = vector.broadcast %cst_21 : f32 to vector<128x128xf32>
    %72 = arith.cmpf ogt, %70, %71 : vector<128x128xf32>
    %73 = math.exp %70 : vector<128x128xf32>
    %cst_22 = arith.constant 1.000000e+00 : f32
    %74 = vector.broadcast %cst_22 : f32 to vector<128x128xf32>
    %75 = arith.subf %73, %74 : vector<128x128xf32>
    %76 = arith.select %72, %70, %75 : vector<128x128xi1>, vector<128x128xf32>
    %77 = vector.extract_strided_slice %1 {offsets = [2, 0], sizes = [2, 128], strides = [1, 1]} : vector<4x128xf32> to vector<2x128xf32>
    %78 = vector.extract_strided_slice %2 {offsets = [2, 0], sizes = [2, 128], strides = [1, 1]} : vector<4x128xf32> to vector<2x128xf32>
    %79 = vector.extract_strided_slice %3 {offsets = [2, 0], sizes = [2, 128], strides = [1, 1]} : vector<4x128xf32> to vector<2x128xf32>
    %80 = arith.mulf %77, %79 : vector<2x128xf32>
    %cst_23 = arith.constant dense<0.000000e+00> : vector<2x128xf32>
    %81 = tpu.matmul %80, %76, %cst_23 {dimension_numbers = #tpu.dot_dimension_numbers<[1], [1], [0], [0], [0, 0, 1, 0], [], []>} : vector<2x128xf32>, vector<128x128xf32>, vector<2x128xf32> -> vector<2x128xf32>
    %82 = vector.extract_strided_slice %77 {offsets = [0, 0], sizes = [1, 128], strides = [1, 1]} : vector<2x128xf32> to vector<1x128xf32>
    %83 = vector.broadcast %82 : vector<1x128xf32> to vector<128x128xf32>
    %84 = arith.mulf %76, %83 : vector<128x128xf32>
    %85 = vector.extract_strided_slice %78 {offsets = [0, 0], sizes = [1, 128], strides = [1, 1]} : vector<2x128xf32> to vector<1x128xf32>
    %86 = vector.broadcast %85 : vector<1x128xf32> to vector<128x128xf32>
    %87 = arith.mulf %84, %86 : vector<128x128xf32>
    %cst_24 = arith.constant dense<0.000000e+00> : vector<128xf32>
    %88 = vector.multi_reduction <add>, %87, %cst_24 [1] : vector<128x128xf32> to vector<128xf32>
    %89 = vector.shape_cast %88 : vector<128xf32> to vector<128x1xf32>
    %90 = vector.extract_strided_slice %81 {offsets = [0, 0], sizes = [1, 128], strides = [1, 1]} : vector<2x128xf32> to vector<1x128xf32>
    %91 = vector.broadcast %89 : vector<128x1xf32> to vector<128x128xf32>
    %92 = vector.broadcast %90 : vector<1x128xf32> to vector<128x128xf32>
    %93 = arith.addf %91, %92 : vector<128x128xf32>
    %cst_25 = arith.constant 0.000000e+00 : f32
    %94 = vector.broadcast %cst_25 : f32 to vector<128x128xf32>
    %95 = arith.cmpf ogt, %93, %94 : vector<128x128xf32>
    %cst_26 = arith.constant 0.000000e+00 : f32
    %96 = vector.broadcast %cst_26 : f32 to vector<128x128xf32>
    %97 = arith.subf %96, %93 : vector<128x128xf32>
    %cst_27 = arith.constant -2.000000e-01 : f32
    %98 = vector.broadcast %cst_27 : f32 to vector<128x128xf32>
    %99 = arith.mulf %98, %93 : vector<128x128xf32>
    %100 = arith.select %95, %97, %99 : vector<128x128xi1>, vector<128x128xf32>
    %101 = math.exp %100 : vector<128x128xf32>
    %102 = arith.mulf %101, %0 : vector<128x128xf32>
    %cst_28 = arith.constant dense<0.000000e+00> : vector<128xf32>
    %103 = vector.multi_reduction <add>, %102, %cst_28 [1] : vector<128x128xf32> to vector<128xf32>
    %104 = vector.shape_cast %103 : vector<128xf32> to vector<128x1xf32>
    %105 = tpu.reciprocal %104 {approx = true} : vector<128x1xf32> -> vector<128x1xf32>
    %106 = vector.broadcast %105 : vector<128x1xf32> to vector<128x128xf32>
    %107 = arith.mulf %102, %106 : vector<128x128xf32>
    %108 = arith.truncf %107 : vector<128x128xf32> to vector<128x128xbf16>
    %109 = arith.truncf %84 : vector<128x128xf32> to vector<128x128xbf16>
    %110 = vector.extract_strided_slice %77 {offsets = [1, 0], sizes = [1, 128], strides = [1, 1]} : vector<2x128xf32> to vector<1x128xf32>
    %111 = vector.broadcast %110 : vector<1x128xf32> to vector<128x128xf32>
    %112 = arith.mulf %76, %111 : vector<128x128xf32>
    %113 = vector.extract_strided_slice %78 {offsets = [1, 0], sizes = [1, 128], strides = [1, 1]} : vector<2x128xf32> to vector<1x128xf32>
    %114 = vector.broadcast %113 : vector<1x128xf32> to vector<128x128xf32>
    %115 = arith.mulf %112, %114 : vector<128x128xf32>
    %cst_29 = arith.constant dense<0.000000e+00> : vector<128xf32>
    %116 = vector.multi_reduction <add>, %115, %cst_29 [1] : vector<128x128xf32> to vector<128xf32>
    %117 = vector.shape_cast %116 : vector<128xf32> to vector<128x1xf32>
    %118 = vector.extract_strided_slice %81 {offsets = [1, 0], sizes = [1, 128], strides = [1, 1]} : vector<2x128xf32> to vector<1x128xf32>
    %119 = vector.broadcast %117 : vector<128x1xf32> to vector<128x128xf32>
    %120 = vector.broadcast %118 : vector<1x128xf32> to vector<128x128xf32>
    %121 = arith.addf %119, %120 : vector<128x128xf32>
    %cst_30 = arith.constant 0.000000e+00 : f32
    %122 = vector.broadcast %cst_30 : f32 to vector<128x128xf32>
    %123 = arith.cmpf ogt, %121, %122 : vector<128x128xf32>
    %cst_31 = arith.constant 0.000000e+00 : f32
    %124 = vector.broadcast %cst_31 : f32 to vector<128x128xf32>
    %125 = arith.subf %124, %121 : vector<128x128xf32>
    %cst_32 = arith.constant -2.000000e-01 : f32
    %126 = vector.broadcast %cst_32 : f32 to vector<128x128xf32>
    %127 = arith.mulf %126, %121 : vector<128x128xf32>
    %128 = arith.select %123, %125, %127 : vector<128x128xi1>, vector<128x128xf32>
    %129 = math.exp %128 : vector<128x128xf32>
    %130 = arith.mulf %129, %0 : vector<128x128xf32>
    %cst_33 = arith.constant dense<0.000000e+00> : vector<128xf32>
    %131 = vector.multi_reduction <add>, %130, %cst_33 [1] : vector<128x128xf32> to vector<128xf32>
    %132 = vector.shape_cast %131 : vector<128xf32> to vector<128x1xf32>
    %133 = tpu.reciprocal %132 {approx = true} : vector<128x1xf32> -> vector<128x1xf32>
    %134 = vector.broadcast %133 : vector<128x1xf32> to vector<128x128xf32>
    %135 = arith.mulf %130, %134 : vector<128x128xf32>
    %136 = arith.truncf %135 : vector<128x128xf32> to vector<128x128xbf16>
    %137 = arith.truncf %112 : vector<128x128xf32> to vector<128x128xbf16>
    %138 = tpu.concatenate %108, %136 in 1 : vector<128x128xbf16>, vector<128x128xbf16> -> vector<128x256xbf16>
    %139 = tpu.concatenate %109, %137 in 0 : vector<128x128xbf16>, vector<128x128xbf16> -> vector<256x128xbf16>
    %cst_34 = arith.constant dense<0.000000e+00> : vector<128x128xf32>
    %140 = tpu.matmul %138, %139, %cst_34 {dimension_numbers = #tpu.dot_dimension_numbers<[1], [0], [0], [1], [0, 0, 1, 1], [], []>} : vector<128x256xbf16>, vector<256x128xbf16>, vector<128x128xf32> -> vector<128x128xf32>
    %cst_35 = arith.constant 5.000000e-01 : f32
    %141 = vector.broadcast %cst_35 : f32 to vector<128x128xf32>
    %142 = arith.mulf %140, %141 : vector<128x128xf32>
    %c0_36 = arith.constant 0 : index
    %c0_37 = arith.constant 0 : index
    %143 = vector.load %arg5[%c0_36, %c0_37] : memref<128x128xf32, #tpu.memory_space<vmem>>, vector<128x128xf32>
    tpu.vector_store %arg5[%c0_36, %c0_37], %142 {strides = array<i32>} : memref<128x128xf32, #tpu.memory_space<vmem>>, vector<128x128xf32>,
    return
  }
}

</mosaic_0001>

<bundles_post_ra>
// kernel: tpu_custom_call.1
= control target key start
LH: loop header
LB: loop body
LE: loop exit
PB: predicated region body
PF: predicated region fallthrough
CT: control target
= control target key end

     0   :  { %10 = vsyncpa [#allocation3], 0  ;;  %s3401_s0 = inlined_call_operand.hbm [shape: f32[128,128], index: 0, kind: input, shape index: {}]   ;;  %s3402_s1 = inlined_call_operand.hbm [shape: f32[128,128], index: 1, kind: input, shape index: {}]   ;;  %s3403_s2 = inlined_call_operand.vmem [shape: f32[4,128], index: 2, kind: input, shape index: {}]   ;;  %s3404_s3 = inlined_call_operand.vmem [shape: f32[4,128], index: 3, kind: input, shape index: {}]   ;;  %s3405_s4 = inlined_call_operand.vmem [shape: f32[4,128], index: 4, kind: input, shape index: {}]   ;;  %s3406_s5 = inlined_call_operand.hbm [shape: f32[128,128], index: 5, kind: output, shape index: {}]  }
   0x1   :  { %11 = vsyncpa [#allocation6], 0 }
   0x2   :  { %12 = vsyncpa [#allocation4], 0  ;;  %s2401_s18 = smov [#allocation2]   ;;  %s2329_s22 = scalar_lea.hbm %s3401_s0, 2048 }
   0x3   :  { %s18_s19 = sshll.u32 %s2401_s18, 4  ;;  %p2330_p0 = scmp.ne.s32.totalorder %s3401_s0, %s2329_s22  ;;  %s19_s19 = int_to_ptr.vmem [resolvable:$true] %s18_s19 }
   0x4   :  { %p2333_p1 = scmp.lt.u32.totalorder %s2329_s22, %s3401_s0 }
   0x6   :  { %p2335_p2 = pnand %p2333_p1, %p2330_p0 }
   0x8   :  { %2338 = shalt.err (!%p2335_p2)
}
   0x9   :  { %s2339_s27 = scalar_lea.vmem %s19_s19, 2048  ;;  %p2344_p4 = scmp.lt.s32.totalorder %s19_s19, %s19_s19 }
   0xa   :  { %p2340_p3 = scmp.ne.s32.totalorder %s19_s19, %s2339_s27  ;;  %p2345_p5 = scmp.lt.s32.totalorder %s2339_s27, %s2339_s27 }
   0xc   :  { %p2346_p6 = por %p2345_p5, %p2344_p4 }
   0xe   :  { %p2347_p7 = pnand %p2346_p6, %p2340_p3 }
  0x10   :  { %2350 = shalt.err (!%p2347_p7)
}
  0x11   :  { %s2402_s28 = smov 128   ;;  %s2403_s29 = smov 8  }
  0x12   :  { %24 = dma.hbm_to_vmem [thread:$0]  %s3401_s0, 2048, %s19_s19, [#allocation3], %s2402_s28, %s2402_s28, %s2403_s29  }
  0x13   :  { %s2404_s7 = smov [#allocation5]   ;;  %s2351_s11 = scalar_lea.hbm %s3402_s1, 2048 }
  0x14   :  { %s30_s8 = sshll.u32 %s2404_s7, 4  ;;  %p2352_p8 = scmp.ne.s32.totalorder %s3402_s1, %s2351_s11  ;;  %s31_s8 = int_to_ptr.vmem [resolvable:$true] %s30_s8 }
  0x15   :  { %p2355_p9 = scmp.lt.u32.totalorder %s2351_s11, %s3402_s1 }
  0x17   :  { %p2357_p10 = pnand %p2355_p9, %p2352_p8 }
  0x19   :  { %2360 = shalt.err (!%p2357_p10)
}
  0x1a   :  { %s2361_s16 = scalar_lea.vmem %s31_s8, 2048  ;;  %p2366_p12 = scmp.lt.s32.totalorder %s31_s8, %s31_s8 }
  0x1b   :  { %p2362_p11 = scmp.ne.s32.totalorder %s31_s8, %s2361_s16  ;;  %p2367_p13 = scmp.lt.s32.totalorder %s2361_s16, %s2361_s16 }
  0x1d   :  { %p2368_p0 = por %p2367_p13, %p2366_p12 }
  0x1f   :  { %p2369_p1 = pnand %p2368_p0, %p2362_p11 }
  0x21   :  { %2372 = shalt.err (!%p2369_p1)
}
  0x22   :  { %36 = dma.hbm_to_vmem [thread:$0]  %s3402_s1, 2048, %s31_s8, [#allocation6], %s2402_s28, %s2402_s28, %s2403_s29  }
  0x23   :  { %2395 = dma.done.wait [#allocation3], 2048  }
  0x24   :  { %2396 = vsyncadd [#allocation3], 4294965248 }
  0x25   :  { %2397 = dma.done.wait [#allocation6], 2048  }
  0x26   :  { %2398 = vsyncadd [#allocation6], 4294965248  ;;  %v3408_v0 = vmov 0.0|0.0   ;;  %vm2406_vm0 = vmmov 0   ;;  %v3407_v1 = vmov 0.0   ;;  %v156_v2 = vlaneseq  ;;  %v69_v4 = vld [vmem:[#allocation2] sm:$0xff] }
  0x27   :  { %1953 = vmatprep.subr.bf16.mxu0 %v3408_v0  ;;  %1915 = vmatprep.mubr.msk.f32.mxu0 %vm2406_vm0, %v3407_v1  ;;  %v70_v5 = vld [vmem:[#allocation2 + $0x8] sm:$0xff]  ;;  %v71_v10 = vld [vmem:[#allocation2 + $0x10] sm:$0xff]  ;;  %v72_v11 = vld [vmem:[#allocation2 + $0x18] sm:$0xff] }
  0x28   :  { %v157_v3 = vshrl.u32 %v156_v2, 7  ;;  %v1954_v6 = vpack.c.bf16 %v70_v5, %v69_v4  ;;  %v2480_v13 = vld [vmem:[%s3403_s2] sm:$0xf]  ;;  %v1957_v18 = vpack.c.bf16 %v72_v11, %v71_v10  ;;  %v74_v31 = vld [vmem:[#allocation2 + $0x28] sm:$0xff]  ;;  %v75_v41 = vld [vmem:[#allocation2 + $0x30] sm:$0xff] }
  0x29   :  { %v67_v14 = vld [vmem:[%s3404_s3] sm:$0xf]  ;;  %v76_v42 = vld [vmem:[#allocation2 + $0x38] sm:$0xff]  ;;  %v78_v53 = vld [vmem:[#allocation2 + $0x48] sm:$0xff] }
  0x2a   :  { %v2472_v7 = vsub.s32 0, %v157_v3  ;;  %v2474_v8 = vsub.s32 1, %v157_v3  ;;  %1955 = vmatpush3.bf16.xpose.msra.mxu0 %v1954_v6  ;;  %v992_v9 = vsub.s32 2, %v157_v3  ;;  %v1276_v12 = vsub.s32 3, %v157_v3  ;;  %v73_v30 = vld [vmem:[#allocation2 + $0x20] sm:$0xff]  ;;  %v79_v63 = vld [vmem:[#allocation2 + $0x50] sm:$0xff] }
  0x2b   :  { %1956 = vmatprep.subr.bf16.mxu0 %v3408_v0  ;;  %v1960_v36 = vpack.c.bf16 %v74_v31, %v73_v30  ;;  %v1963_v47 = vpack.c.bf16 %v76_v42, %v75_v41  ;;  %v77_v52 = vld [vmem:[#allocation2 + $0x40] sm:$0xff]  ;;  %v80_v2 = vld [vmem:[#allocation2 + $0x58] sm:$0xff] }
  0x2c   :  { %3422 = vst [vmem:[#allocation11_spill] sm:$0xff] %v2472_v7  ;;  %3423 = vst [vmem:[#allocation12_spill] sm:$0xff] %v2474_v8  ;;  %v2487_v15 = vrot.slane %v2480_v13, %v2472_v7  ;;  %v2490_v16 = vrot.slane %v67_v14, %v2472_v7  ;;  %v2494_v17 = vrot.slane %v2480_v13, %v2474_v8 }
  0x2d   :  { %v2497_v19 = vrot.slane %v67_v14, %v2474_v8  ;;  %v2500_v20 = vrot.slane %v2480_v13, %v992_v9  ;;  %v2502_v21 = vrot.slane %v67_v14, %v992_v9  ;;  %v2505_v22 = vrot.slane %v2480_v13, %v1276_v12 }
  0x2e   :  { %v2507_v23 = vrot.slane %v67_v14, %v1276_v12  ;;  %v2510_v24 = vmul.f32 %v2494_v17, %v69_v4  ;;  %v2513_v25 = vmul.f32 %v2487_v15, %v69_v4  ;;  %v2516_v26 = vmul.f32 %v2494_v17, %v70_v5 }
  0x2f   :  { %3424 = vst [vmem:[#allocation13_spill] sm:$0xff] %v2500_v20  ;;  %3425 = vst [vmem:[#allocation14_spill] sm:$0xff] %v2502_v21  ;;  %v2519_v27 = vmul.f32 %v2487_v15, %v70_v5  ;;  %v2529_v33 = vmul.f32 %v2494_v17, %v71_v10  ;;  %v2534_v35 = vmul.f32 %v2494_v17, %v72_v11 }
  0x30   :  { %3426 = vst [vmem:[#allocation15_spill] sm:$0xff] %v2505_v22  ;;  %3427 = vst [vmem:[#allocation16_spill] sm:$0xff] %v2507_v23  ;;  %v464_v28 = vmul.f32 %v2497_v19, %v2510_v24  ;;  %v180_v29 = vmul.f32 %v2490_v16, %v2513_v25  ;;  %v465_v32 = vmul.f32 %v2497_v19, %v2516_v26 }
  0x31   :  { %v181_v34 = vmul.f32 %v2490_v16, %v2519_v27  ;;  %v466_v37 = vmul.f32 %v2497_v19, %v2529_v33  ;;  %v2539_v38 = vmul.f32 %v2487_v15, %v71_v10  ;;  %v467_v39 = vmul.f32 %v2497_v19, %v2534_v35 }
  0x32   :  { %1958 = vmatpush3.bf16.xpose.msra.mxu0 %v1957_v18  ;;  %480 = vadd.xlane.f32.xlu0 %v464_v28  ;;  %v2544_v40 = vmul.f32 %v2487_v15, %v72_v11  ;;  %v2550_v44 = vmul.f32 %v2494_v17, %v73_v30  ;;  %v2555_v46 = vmul.f32 %v2494_v17, %v74_v31  ;;  %v81_v18 = vld [vmem:[#allocation2 + $0x60] sm:$0xff]  ;;  %v82_v28 = vld [vmem:[#allocation2 + $0x68] sm:$0xff] }
  0x33   :  { %1959 = vmatprep.subr.bf16.mxu0 %v3408_v0  ;;  %196 = vadd.xlane.f32.xlu1 %v180_v29  ;;  %v182_v43 = vmul.f32 %v2490_v16, %v2539_v38  ;;  %v2560_v49 = vmul.f32 %v2487_v15, %v73_v30  ;;  %v2565_v51 = vmul.f32 %v2487_v15, %v74_v31 }
  0x34   :  { %v183_v45 = vmul.f32 %v2490_v16, %v2544_v40  ;;  %v468_v48 = vmul.f32 %v2497_v19, %v2550_v44  ;;  %v469_v50 = vmul.f32 %v2497_v19, %v2555_v46  ;;  %v2571_v55 = vmul.f32 %v2494_v17, %v75_v41 }
  0x35   :  { %v184_v54 = vmul.f32 %v2490_v16, %v2560_v49  ;;  %v185_v56 = vmul.f32 %v2490_v16, %v2565_v51  ;;  %v2576_v57 = vmul.f32 %v2494_v17, %v76_v42  ;;  %v1966_v58 = vpack.c.bf16 %v78_v53, %v77_v52 }
  0x36   :  { %482 = vadd.xlane.f32.xlu0 %v465_v32  ;;  %v470_v59 = vmul.f32 %v2497_v19, %v2571_v55  ;;  %v2581_v60 = vmul.f32 %v2487_v15, %v75_v41  ;;  %v2586_v62 = vmul.f32 %v2487_v15, %v76_v42  ;;  %v2592_v4 = vmul.f32 %v2494_v17, %v77_v52  ;;  %v83_v42 = vld [vmem:[#allocation2 + $0x70] sm:$0xff] }
  0x37   :  { %198 = vadd.xlane.f32.xlu1 %v181_v34  ;;  %v471_v61 = vmul.f32 %v2497_v19, %v2576_v57  ;;  %v2597_v6 = vmul.f32 %v2494_v17, %v78_v53  ;;  %v1969_v9 = vpack.c.bf16 %v80_v2, %v79_v63  ;;  %v2602_v11 = vmul.f32 %v2487_v15, %v77_v52 }
  0x38   :  { %v186_v3 = vmul.f32 %v2490_v16, %v2581_v60  ;;  %v187_v5 = vmul.f32 %v2490_v16, %v2586_v62  ;;  %v472_v10 = vmul.f32 %v2497_v19, %v2592_v4  ;;  %v2607_v14 = vmul.f32 %v2487_v15, %v78_v53 }
  0x39   :  { %v473_v12 = vmul.f32 %v2497_v19, %v2597_v6  ;;  %v188_v29 = vmul.f32 %v2490_v16, %v2602_v11  ;;  %v2613_v30 = vmul.f32 %v2494_v17, %v79_v63  ;;  %v2618_v32 = vmul.f32 %v2494_v17, %v80_v2 }
  0x3a   :  { %1961 = vmatpush3.bf16.xpose.msra.mxu0 %v1960_v36  ;;  %484 = vadd.xlane.f32.xlu0 %v466_v37  ;;  %v189_v31 = vmul.f32 %v2490_v16, %v2607_v14  ;;  %v1972_v34 = vpack.c.bf16 %v82_v28, %v81_v18  ;;  %v2623_v37 = vmul.f32 %v2487_v15, %v79_v63 }
  0x3b   :  { %1962 = vmatprep.subr.bf16.mxu0 %v3408_v0  ;;  %486 = vadd.xlane.f32.xlu1 %v467_v39  ;;  %v474_v36 = vmul.f32 %v2497_v19, %v2613_v30  ;;  %v475_v39 = vmul.f32 %v2497_v19, %v2618_v32  ;;  %v2628_v41 = vmul.f32 %v2487_v15, %v80_v2 }
  0x3c   :  { %v2657_v63 = vmul.f32 %v2494_v17, %v83_v42 }
  0x3e   :  { %200 = vadd.xlane.f32.xlu0 %v182_v43  ;;  %v84_v43 = vld [vmem:[#allocation2 + $0x78] sm:$0xff]  ;;  %3429 = vst [vmem:[#allocation18_spill] sm:$0xff] %v2657_v63 }
  0x3f   :  { %202 = vadd.xlane.f32.xlu1 %v183_v45  ;;  %v190_v45 = vmul.f32 %v2490_v16, %v2623_v37  ;;  %v1975_v52 = vpack.c.bf16 %v84_v43, %v83_v42 }
  0x42   :  { %1964 = vmatpush3.bf16.xpose.msra.mxu0 %v1963_v47  ;;  %488 = vadd.xlane.f32.xlu0 %v468_v48  ;;  %v2634_v47 = vmul.f32 %v2494_v17, %v81_v18  ;;  %v191_v48 = vmul.f32 %v2490_v16, %v2628_v41 }
  0x43   :  { %1965 = vmatprep.subr.bf16.mxu0 %v3408_v0  ;;  %490 = vadd.xlane.f32.xlu1 %v469_v50  ;;  %v2639_v50 = vmul.f32 %v2494_v17, %v82_v28 }
  0x44   :  { %v476_v53 = vmul.f32 %v2497_v19, %v2634_v47 }
  0x46   :  { %204 = vadd.xlane.f32.xlu0 %v184_v54  ;;  %v2644_v54 = vmul.f32 %v2487_v15, %v81_v18  ;;  %v2675_v18 = vmul.f32 %v2487_v15, %v84_v43 }
  0x47   :  { %206 = vadd.xlane.f32.xlu1 %v185_v56  ;;  %v477_v56 = vmul.f32 %v2497_v19, %v2639_v50 }
  0x48   :  { %3433 = vst [vmem:[#allocation22_spill] sm:$0xff] %v2675_v18 }
  0x4a   :  { %1967 = vmatpush3.bf16.xpose.msra.mxu0 %v1966_v58  ;;  %492 = vadd.xlane.f32.xlu0 %v470_v59  ;;  %v2649_v58 = vmul.f32 %v2487_v15, %v82_v28  ;;  %v68_v59 = vld [vmem:[%s3405_s4] sm:$0xf]  ;;  %s2408_s4 = smov [#allocation7]  }
  0x4b   :  { %1968 = vmatprep.subr.bf16.mxu0 %v3408_v0  ;;  %494 = vadd.xlane.f32.xlu1 %v471_v61  ;;  %v192_v61 = vmul.f32 %v2490_v16, %v2644_v54  ;;  %s1692_s21 = sshll.u32 %s2408_s4, 4  ;;  %s1693_s21 = int_to_ptr.vmem [resolvable:$true] %s1692_s21 }
  0x4c   :  { %3428 = vst [vmem:[#allocation17_spill] sm:$0xff] %v2649_v58  ;;  %v193_v2 = vmul.f32 %v2490_v16, %v2649_v58  ;;  %s2373_s22 = scalar_lea.vmem %s1693_s21, 2048  ;;  %p2378_p3 = scmp.lt.s32.totalorder %s1693_s21, %s1693_s21 }
  0x4d   :  { %p2374_p2 = scmp.ne.s32.totalorder %s1693_s21, %s2373_s22  ;;  %p2379_p4 = scmp.lt.s32.totalorder %s2373_s22, %s2373_s22 }
  0x4e   :  { %208 = vadd.xlane.f32.xlu0 %v186_v3  ;;  %v2662_v3 = vmul.f32 %v2494_v17, %v84_v43  ;;  %v195_v17 = vmul.f32 %v2490_v16, %v2675_v18 }
  0x4f   :  { %210 = vadd.xlane.f32.xlu1 %v187_v5  ;;  %v2665_v5 = vmul.f32 %v68_v59, %v2480_v13  ;;  %v716_v59 = vpack.c.bf16 %v2516_v26, %v2510_v24  ;;  %v434_v24 = vpack.c.bf16 %v2565_v51, %v2560_v49  ;;  %v719_v26 = vpack.c.bf16 %v2576_v57, %v2571_v55  ;;  %p2380_p5 = por %p2379_p4, %p2378_p3 }
  0x50   :  { %3430 = vst [vmem:[#allocation19_spill] sm:$0xff] %v2662_v3 }
  0x51   :  { %3431 = vst [vmem:[#allocation20_spill] sm:$0xff] %v2665_v5  ;;  %1738 = vmatprep.subr.bf16.mxu1 %v716_v59  ;;  %p2381_p6 = pnand %p2380_p5, %p2374_p2 }
  0x52   :  { %1970 = vmatpush3.bf16.xpose.msra.mxu0 %v1969_v9  ;;  %496 = vadd.xlane.f32.xlu0 %v472_v10  ;;  %v478_v9 = vmul.f32 %v2497_v19, %v2657_v63  ;;  %v2670_v10 = vmul.f32 %v2487_v15, %v83_v42 }
  0x53   :  { %1971 = vmatprep.subr.bf16.mxu0 %v3408_v0  ;;  %498 = vadd.xlane.f32.xlu1 %v473_v12  ;;  %v479_v12 = vmul.f32 %v2497_v19, %v2662_v3 }
  0x54   :  { %3432 = vst [vmem:[#allocation21_spill] sm:$0xff] %v2670_v10  ;;  %v194_v13 = vmul.f32 %v2490_v16, %v2670_v10 }
  0x56   :  { %212 = vadd.xlane.f32.xlu0 %v188_v29 }
  0x57   :  { %214 = vadd.xlane.f32.xlu1 %v189_v31 }
  0x5a   :  { %1973 = vmatpush3.bf16.xpose.msra.mxu0 %v1972_v34  ;;  %500 = vadd.xlane.f32.xlu0 %v474_v36 }
  0x5b   :  { %1974 = vmatprep.subr.bf16.mxu0 %v3408_v0  ;;  %502 = vadd.xlane.f32.xlu1 %v475_v39 }
  0x5e   :  { %216 = vadd.xlane.f32.xlu0 %v190_v45 }
  0x5f   :  { %218 = vadd.xlane.f32.xlu1 %v191_v48 }
  0x62   :  { %1976 = vmatpush3.bf16.xpose.msra.mxu0 %v1975_v52  ;;  %504 = vadd.xlane.f32.xlu0 %v476_v53 }
  0x63   :  { %506 = vadd.xlane.f32.xlu1 %v477_v56 }
  0x66   :  { %220 = vadd.xlane.f32.xlu0 %v192_v61  ;;  %v432_v61 = vpack.c.bf16 %v2519_v27, %v2513_v25 }
  0x67   :  { %222 = vadd.xlane.f32.xlu1 %v193_v2  ;;  %v717_v2 = vpack.c.bf16 %v2534_v35, %v2529_v33 }
  0x68   :  { %1739 = vmatpush3.bf16.msra.mxu1 %v432_v61 }
  0x69   :  { %1916 = vmatmul.mubr.f32.vlgmr.msra.gmra.mrb[0].mxu0 %v2665_v5  ;;  %1740 = vmatprep.subr.bf16.mxu1 %v717_v2 }
  0x6a   :  { %508 = vadd.xlane.f32.xlu0 %v478_v9 }
  0x6b   :  { %510 = vadd.xlane.f32.xlu1 %v479_v12 }
  0x6e   :  { %224 = vadd.xlane.f32.xlu0 %v194_v13  ;;  %v433_v13 = vpack.c.bf16 %v2544_v40, %v2539_v38 }
  0x6f   :  { %226 = vadd.xlane.f32.xlu1 %v195_v17  ;;  %v718_v17 = vpack.c.bf16 %v2555_v46, %v2550_v44 }
  0x70   :  { %1741 = vmatpush3.bf16.msra.mxu1 %v433_v13 }
  0x71   :  { %1742 = vmatprep.subr.bf16.mxu1 %v718_v17 }
  0x74   :  { %1743 = vmatpush3.bf16.msra.mxu1 %v434_v24 }
  0x75   :  { %1744 = vmatprep.subr.bf16.mxu1 %v719_v26 }
  0xbf   :  { %v481_v28 = vpop.xlane.xlu0 %480 }
  0xc0   :  { %v197_v29 = vpop.xlane.xlu1 %196 }
  0xc3   :  { %v483_v31 = vpop.xlane.xlu0 %482 }
  0xc4   :  { %v199_v34 = vpop.xlane.xlu1 %198 }
  0xc7   :  { %v485_v19 = vpop.xlane.xlu0 %484 }
  0xc8   :  { %v487_v36 = vpop.xlane.xlu1 %486 }
  0xcb   :  { %v2682_v15 = vpop.xlane.xlu0 %200 }
  0xcc   :  { %v2684_v39 = vpop.xlane.xlu1 %202 }
  0xcf   :  { %v2686_v42 = vpop.xlane.xlu0 %488 }
  0xd0   :  { %v2688_v43 = vpop.xlane.xlu1 %490 }
  0xd3   :  { %v2690_v45 = vpop.xlane.xlu0 %204 }
  0xd4   :  { %v2692_v48 = vpop.xlane.xlu1 %206 }
  0xd7   :  { %v2694_v16 = vpop.xlane.xlu0 %492 }
  0xd8   :  { %v2696_v52 = vpop.xlane.xlu1 %494 }
  0xdb   :  { %v2698_v53 = vpop.xlane.xlu0 %208 }
  0xdc   :  { %v2700_v56 = vpop.xlane.xlu1 %210 }
  0xdf   :  { %v2708_v9 = vpop.xlane.xlu0 %496 }
  0xe0   :  { %v2710_v12 = vpop.xlane.xlu1 %498 }
  0xe3   :  { %v2718_v25 = vpop.xlane.xlu0 %212 }
  0xe4   :  { %v2722_v27 = vpop.xlane.xlu1 %214 }
  0xe7   :  { %v2724_v33 = vpop.xlane.xlu0 %500 }
  0xe8   :  { %v2726_v35 = vpop.xlane.xlu1 %502 }
  0xeb   :  { %v2728_v38 = vpop.xlane.xlu0 %216 }
  0xec   :  { %v2730_v40 = vpop.xlane.xlu1 %218 }
  0xef   :  { %v2732_v44 = vpop.xlane.xlu0 %504 }
  0xf0   :  { %v2734_v46 = vpop.xlane.xlu1 %506 }
  0xf3   :  { %v2736_v49 = vpop.xlane.xlu0 %220 }
  0xf4   :  { %v2738_v51 = vpop.xlane.xlu1 %222 }
  0xf7   :  { %v2740_v55 = vpop.xlane.xlu0 %508 }
  0xf8   :  { %v2742_v57 = vpop.xlane.xlu1 %510 }
  0xfb   :  { %v225_v17 = vpop.xlane.xlu0 %224 }
  0xfc   :  { %v227_v24 = vpop.xlane.xlu1 %226 }
 0x13c   :  { %v152_v59 = vpop.f32.mrb[0].mxu0 }
 0x13d   :  { %v2745_v61 = vrot.slane %v152_v59, %v2472_v7  ;;  %v2748_v2 = vrot.slane %v152_v59, %v2474_v8  ;;  %v1917_v13 = vpop.f32.mrb[1].mxu0 }
 0x13f   :  { %v517_v26 = vadd.f32 %v2748_v2, %v483_v31  ;;  %v516_v1 = vadd.f32 %v2748_v2, %v481_v28  ;;  %v233_v0 = vadd.f32 %v2745_v61, %v199_v34  ;;  %v2754_v5 = vadd.f32 %v2745_v61, %v225_v17 }
 0x140   :  { %v2757_v21 = vadd.f32 %v2745_v61, %v227_v24  ;;  %v232_v13 = vadd.f32 %v2745_v61, %v197_v29  ;;  %v519_v31 = vadd.f32 %v2748_v2, %v487_v36  ;;  %v518_v28 = vadd.f32 %v2748_v2, %v485_v19 }
 0x141   :  { %vm533_vm1 = vcmp.gt.f32.partialorder %v517_v26, 0.0  ;;  %v549_v7 = vsub.f32 0.0, %v517_v26  ;;  %v565_v23 = vmul.f32 -0.2, %v517_v26  ;;  %vm532_vm2 = vcmp.gt.f32.partialorder %v516_v1, 0.0 }
 0x142   :  { %v548_v59 = vsub.f32 0.0, %v516_v1  ;;  %v564_v8 = vmul.f32 -0.2, %v516_v1  ;;  %vm249_vm3 = vcmp.gt.f32.partialorder %v233_v0, 0.0  ;;  %v265_v22 = vsub.f32 0.0, %v233_v0 }
 0x143   :  { %v581_v17 = vsel %vm533_vm1, %v549_v7, %v565_v23  ;;  %v281_v20 = vmul.f32 -0.2, %v233_v0  ;;  %v2764_v24 = vmul.f32 -0.2, %v2754_v5  ;;  %vm248_vm4 = vcmp.gt.f32.partialorder %v232_v13, 0.0 }
 0x144   :  { %v598_v18 = vmul.f32 1.442695, %v581_v17  ;;  %v580_v10 = vsel %vm532_vm2, %v548_v59, %v564_v8  ;;  %v264_v1 = vsub.f32 0.0, %v232_v13  ;;  %v280_v63 = vmul.f32 -0.2, %v232_v13 }
 0x145   :  { %v596_v3 = vmul.f32 1.442695, %v580_v10  ;;  %v297_v29 = vsel %vm249_vm3, %v265_v22, %v281_v20  ;;  %vm535_vm5 = vcmp.gt.f32.partialorder %v519_v31, 0.0  ;;  %v551_v19 = vsub.f32 0.0, %v519_v31 }
 0x146   :  { %2025 = vpow2.f32 %v598_v18  ;;  %v314_v36 = vmul.f32 1.442695, %v297_v29  ;;  %v567_v7 = vmul.f32 -0.2, %v519_v31  ;;  %vm534_vm6 = vcmp.gt.f32.partialorder %v518_v28, 0.0 }
 0x147   :  { %2027 = vpow2.f32 %v596_v3  ;;  %v296_v0 = vsel %vm248_vm4, %v264_v1, %v280_v63  ;;  %v550_v23 = vsub.f32 0.0, %v518_v28  ;;  %v566_v34 = vmul.f32 -0.2, %v518_v28  ;;  %v51_v28 = vld [vmem:[#allocation5 + $0x8] sm:$0xff] }
 0x148   :  { %2029 = vpow2.f32 %v314_v36  ;;  %v312_v58 = vmul.f32 1.442695, %v296_v0  ;;  %v583_v26 = vsel %vm535_vm5, %v551_v19, %v567_v7  ;;  %v235_v8 = vadd.f32 %v2745_v61, %v2684_v39 }
 0x149   :  { %v234_v20 = vadd.f32 %v2745_v61, %v2682_v15  ;;  %v602_v22 = vmul.f32 1.442695, %v583_v26  ;;  %v582_v10 = vsel %vm534_vm6, %v550_v23, %v566_v34  ;;  %v521_v3 = vadd.f32 %v2748_v2, %v2688_v43  ;;  %v50_v26 = vld [vmem:[#allocation5] sm:$0xff] }
 0x14a   :  { %v520_v18 = vadd.f32 %v2748_v2, %v2686_v42  ;;  %2031 = vpow2.f32 %v312_v58  ;;  %v600_v63 = vmul.f32 1.442695, %v582_v10  ;;  %vm251_vm7 = vcmp.gt.f32.partialorder %v235_v8, 0.0 }
 0x14b   :  { %v267_v59 = vsub.f32 0.0, %v235_v8  ;;  %2033 = vpow2.f32 %v602_v22  ;;  %v283_v13 = vmul.f32 -0.2, %v235_v8  ;;  %vm250_vm8 = vcmp.gt.f32.partialorder %v234_v20, 0.0 }
 0x14c   :  { %v266_v31 = vsub.f32 0.0, %v234_v20  ;;  %2035 = vpow2.f32 %v600_v63  ;;  %v282_v39 = vmul.f32 -0.2, %v234_v20  ;;  %vm537_vm9 = vcmp.gt.f32.partialorder %v521_v3, 0.0 }
 0x14d   :  { %v553_v15 = vsub.f32 0.0, %v521_v3  ;;  %v299_v34 = vsel %vm251_vm7, %v267_v59, %v283_v13  ;;  %v569_v17 = vmul.f32 -0.2, %v521_v3  ;;  %vm536_vm10 = vcmp.gt.f32.partialorder %v520_v18, 0.0  ;;  %v53_v13 = vld [vmem:[#allocation5 + $0x18] sm:$0xff] }
 0x14e   :  { %v552_v43 = vsub.f32 0.0, %v520_v18  ;;  %v318_v29 = vmul.f32 1.442695, %v299_v34  ;;  %v298_v42 = vsel %vm250_vm8, %v266_v31, %v282_v39  ;;  %v568_v58 = vmul.f32 -0.2, %v520_v18 }
 0x14f   :  { %v237_v1 = vadd.f32 %v2745_v61, %v2692_v48  ;;  %v316_v19 = vmul.f32 1.442695, %v298_v42  ;;  %v585_v7 = vsel %vm537_vm9, %v553_v15, %v569_v17  ;;  %v236_v0 = vadd.f32 %v2745_v61, %v2690_v45  ;;  %v52_v15 = vld [vmem:[#allocation5 + $0x10] sm:$0xff] }
 0x150   :  { %v2026_v36 = vpop.eup %2025  ;;  %v523_v23 = vadd.f32 %v2748_v2, %v2696_v52  ;;  %2037 = vpow2.f32 %v318_v29  ;;  %v606_v22 = vmul.f32 1.442695, %v585_v7  ;;  %v584_v10 = vsel %vm536_vm10, %v552_v43, %v568_v58 }
 0x151   :  { %v2028_v8 = vpop.eup %2027  ;;  %v2781_v20 = vmul.f32 %v2026_v36, %v51_v28  ;;  %2039 = vpow2.f32 %v316_v19  ;;  %v604_v48 = vmul.f32 1.442695, %v584_v10  ;;  %vm253_vm11 = vcmp.gt.f32.partialorder %v237_v1, 0.0 }
 0x152   :  { %v2030_v3 = vpop.eup %2029  ;;  %v2784_v63 = vmul.f32 %v2028_v8, %v50_v26  ;;  %2041 = vpow2.f32 %v606_v22  ;;  %v269_v45 = vsub.f32 0.0, %v237_v1  ;;  %v285_v52 = vmul.f32 -0.2, %v237_v1 }
 0x153   :  { %646 = vadd.xlane.f32.xlu1 %v2781_v20  ;;  %v2787_v59 = vmul.f32 %v2030_v3, %v51_v28  ;;  %2043 = vpow2.f32 %v604_v48  ;;  %vm252_vm12 = vcmp.gt.f32.partialorder %v236_v0, 0.0  ;;  %v268_v18 = vsub.f32 0.0, %v236_v0 }
 0x154   :  { %644 = vadd.xlane.f32.xlu0 %v2784_v63  ;;  %v284_v31 = vmul.f32 -0.2, %v236_v0  ;;  %v2032_v39 = vpop.eup %2031  ;;  %v301_v34 = vsel %vm253_vm11, %v269_v45, %v285_v52  ;;  %vm539_vm13 = vcmp.gt.f32.partialorder %v523_v23, 0.0  ;;  %v555_v17 = vsub.f32 0.0, %v523_v23 }
 0x155   :  { %v571_v43 = vmul.f32 -0.2, %v523_v23  ;;  %v2034_v29 = vpop.eup %2033  ;;  %v2790_v42 = vmul.f32 %v2032_v39, %v50_v26  ;;  %v322_v28 = vmul.f32 1.442695, %v301_v34  ;;  %v522_v1 = vadd.f32 %v2748_v2, %v2694_v16 }
 0x156   :  { %v300_v58 = vsel %vm252_vm12, %v268_v18, %v284_v31  ;;  %v2036_v36 = vpop.eup %2035  ;;  %v2795_v19 = vmul.f32 %v2034_v29, %v53_v13  ;;  %v239_v8 = vadd.f32 %v2745_v61, %v2700_v56  ;;  %v238_v48 = vadd.f32 %v2745_v61, %v2698_v53  ;;  %v55_v56 = vld [vmem:[#allocation5 + $0x28] sm:$0xff]  ;;  %v54_v53 = vld [vmem:[#allocation5 + $0x20] sm:$0xff] }
 0x157   :  { %362 = vadd.xlane.f32.xlu1 %v2787_v59  ;;  %v320_v7 = vmul.f32 1.442695, %v300_v58  ;;  %v587_v0 = vsel %vm539_vm13, %v555_v17, %v571_v43  ;;  %v2800_v23 = vmul.f32 %v2036_v36, %v52_v15  ;;  %2045 = vpow2.f32 %v322_v28 }
 0x158   :  { %360 = vadd.xlane.f32.xlu0 %v2790_v42  ;;  %v610_v26 = vmul.f32 1.442695, %v587_v0  ;;  %vm538_vm14 = vcmp.gt.f32.partialorder %v522_v1, 0.0  ;;  %v554_v22 = vsub.f32 0.0, %v522_v1  ;;  %v570_v16 = vmul.f32 -0.2, %v522_v1 }
 0x159   :  { %2047 = vpow2.f32 %v320_v7  ;;  %vm255_vm15 = vcmp.gt.f32.partialorder %v239_v8, 0.0  ;;  %v271_v10 = vsub.f32 0.0, %v239_v8  ;;  %v287_v3 = vmul.f32 -0.2, %v239_v8 }
 0x15a   :  { %2049 = vpow2.f32 %v610_v26  ;;  %v2038_v45 = vpop.eup %2037  ;;  %v586_v52 = vsel %vm538_vm14, %v554_v22, %v570_v16  ;;  %v525_v18 = vadd.f32 %v2748_v2, %v2710_v12  ;;  %v524_v31 = vadd.f32 %v2748_v2, %v2708_v9 }
 0x15b   :  { %650 = vadd.xlane.f32.xlu1 %v2795_v19  ;;  %v241_v39 = vadd.f32 %v2745_v61, %v2722_v27  ;;  %v2040_v34 = vpop.eup %2039  ;;  %v2812_v17 = vmul.f32 %v2038_v45, %v53_v13  ;;  %v608_v43 = vmul.f32 1.442695, %v586_v52  ;;  %v303_v29 = vsel %vm255_vm15, %v271_v10, %v287_v3 }
 0x15c   :  { %648 = vadd.xlane.f32.xlu0 %v2800_v23  ;;  %vm254_vm1 = vcmp.gt.f32.partialorder %v238_v48, 0.0  ;;  %v2042_v28 = vpop.eup %2041  ;;  %v2815_v58 = vmul.f32 %v2040_v34, %v52_v15  ;;  %v326_v12 = vmul.f32 1.442695, %v303_v29  ;;  %v270_v1 = vsub.f32 0.0, %v238_v48  ;;  %v57_v29 = vld [vmem:[#allocation5 + $0x38] sm:$0xff] }
 0x15d   :  { %v286_v36 = vmul.f32 -0.2, %v238_v48  ;;  %v2044_v9 = vpop.eup %2043  ;;  %v2817_v7 = vmul.f32 %v2042_v28, %v55_v56  ;;  %2051 = vpow2.f32 %v608_v43  ;;  %vm541_vm2 = vcmp.gt.f32.partialorder %v525_v18, 0.0 }
 0x15e   :  { %v557_v27 = vsub.f32 0.0, %v525_v18  ;;  %v2820_v13 = vmul.f32 %v2044_v9, %v54_v53  ;;  %2053 = vpow2.f32 %v326_v12  ;;  %v573_v8 = vmul.f32 -0.2, %v525_v18 }
 0x15f   :  { %366 = vadd.xlane.f32.xlu1 %v2812_v17  ;;  %v302_v0 = vsel %vm254_vm1, %v270_v1, %v286_v36  ;;  %vm540_vm3 = vcmp.gt.f32.partialorder %v524_v31, 0.0  ;;  %v556_v26 = vsub.f32 0.0, %v524_v31  ;;  %v572_v22 = vmul.f32 -0.2, %v524_v31 }
 0x160   :  { %364 = vadd.xlane.f32.xlu0 %v2815_v58  ;;  %v324_v15 = vmul.f32 1.442695, %v302_v0  ;;  %v589_v16 = vsel %vm541_vm2, %v557_v27, %v573_v8  ;;  %vm257_vm4 = vcmp.gt.f32.partialorder %v241_v39, 0.0  ;;  %v273_v10 = vsub.f32 0.0, %v241_v39 }
 0x161   :  { %v289_v3 = vmul.f32 -0.2, %v241_v39  ;;  %v2046_v48 = vpop.eup %2045  ;;  %v614_v45 = vmul.f32 1.442695, %v589_v16  ;;  %v588_v52 = vsel %vm540_vm3, %v556_v26, %v572_v22  ;;  %v240_v34 = vadd.f32 %v2745_v61, %v2718_v25 }
 0x162   :  { %2055 = vpow2.f32 %v324_v15  ;;  %v2826_v18 = vmul.f32 -0.2, %v2757_v21  ;;  %v612_v28 = vmul.f32 1.442695, %v588_v52  ;;  %v527_v12 = vadd.f32 %v2748_v2, %v2726_v35  ;;  %v56_v35 = vld [vmem:[#allocation5 + $0x30] sm:$0xff] }
 0x163   :  { %v2048_v43 = vpop.eup %2047  ;;  %654 = vadd.xlane.f32.xlu1 %v2817_v7  ;;  %v305_v31 = vsel %vm257_vm4, %v273_v10, %v289_v3  ;;  %v2832_v1 = vmul.f32 %v2046_v48, %v55_v56  ;;  %2057 = vpow2.f32 %v614_v45  ;;  %vm256_vm5 = vcmp.gt.f32.partialorder %v240_v34, 0.0 }
 0x164   :  { %v2050_v39 = vpop.eup %2049  ;;  %652 = vadd.xlane.f32.xlu0 %v2820_v13  ;;  %v330_v36 = vmul.f32 1.442695, %v305_v31  ;;  %v2834_v25 = vmul.f32 %v2048_v43, %v54_v53  ;;  %2059 = vpow2.f32 %v612_v28  ;;  %v272_v9 = vsub.f32 0.0, %v240_v34 }
 0x165   :  { %v288_v27 = vmul.f32 -0.2, %v240_v34  ;;  %v2836_v0 = vmul.f32 %v2050_v39, %v57_v29  ;;  %vm543_vm6 = vcmp.gt.f32.partialorder %v527_v12, 0.0  ;;  %v559_v8 = vsub.f32 0.0, %v527_v12 }
 0x166   :  { %v575_v15 = vmul.f32 -0.2, %v527_v12  ;;  %v526_v56 = vadd.f32 %v2748_v2, %v2724_v33  ;;  %v243_v22 = vadd.f32 %v2745_v61, %v2730_v40  ;;  %v242_v53 = vadd.f32 %v2745_v61, %v2728_v38 }
 0x167   :  { %370 = vadd.xlane.f32.xlu1 %v2832_v1  ;;  %v304_v26 = vsel %vm256_vm5, %v272_v9, %v288_v27  ;;  %v2052_v16 = vpop.eup %2051  ;;  %2061 = vpow2.f32 %v330_v36  ;;  %v529_v48 = vadd.f32 %v2748_v2, %v2734_v46  ;;  %v528_v33 = vadd.f32 %v2748_v2, %v2732_v44  ;;  %v59_v44 = vld [vmem:[#allocation5 + $0x48] sm:$0xff] }
 0x168   :  { %368 = vadd.xlane.f32.xlu0 %v2834_v25  ;;  %v328_v10 = vmul.f32 1.442695, %v304_v26  ;;  %v591_v3 = vsel %vm543_vm6, %v559_v8, %v575_v15  ;;  %v2054_v45 = vpop.eup %2053  ;;  %vm542_vm7 = vcmp.gt.f32.partialorder %v526_v56, 0.0  ;;  %v558_v34 = vsub.f32 0.0, %v526_v56 }
 0x169   :  { %v618_v52 = vmul.f32 1.442695, %v591_v3  ;;  %v2850_v40 = vmul.f32 %v2052_v16, %v56_v35  ;;  %v574_v38 = vmul.f32 -0.2, %v526_v56  ;;  %vm259_vm8 = vcmp.gt.f32.partialorder %v243_v22, 0.0  ;;  %v58_v56 = vld [vmem:[#allocation5 + $0x40] sm:$0xff] }
 0x16a   :  { %2063 = vpow2.f32 %v328_v10  ;;  %v275_v43 = vsub.f32 0.0, %v243_v22  ;;  %v291_v28 = vmul.f32 -0.2, %v243_v22  ;;  %vm258_vm9 = vcmp.gt.f32.partialorder %v242_v53, 0.0 }
 0x16b   :  { %658 = vadd.xlane.f32.xlu1 %v2836_v0  ;;  %2065 = vpow2.f32 %v618_v52  ;;  %v2854_v46 = vmul.f32 %v2054_v45, %v57_v29  ;;  %v590_v12 = vsel %vm542_vm7, %v558_v34, %v574_v38  ;;  %v274_v39 = vsub.f32 0.0, %v242_v53 }
 0x16c   :  { %v2056_v31 = vpop.eup %2055  ;;  %656 = vadd.xlane.f32.xlu0 %v2850_v40  ;;  %v290_v36 = vmul.f32 -0.2, %v242_v53  ;;  %vm263_vm10 = vcmp.gt.f32.partialorder %v2757_v21, 0.0  ;;  %v616_v9 = vmul.f32 1.442695, %v590_v12  ;;  %v307_v27 = vsel %vm259_vm8, %v275_v43, %v291_v28 }
 0x16d   :  { %vm545_vm11 = vcmp.gt.f32.partialorder %v529_v48, 0.0  ;;  %v561_v8 = vsub.f32 0.0, %v529_v48  ;;  %v2058_v15 = vpop.eup %2057  ;;  %v2857_v26 = vmul.f32 %v2056_v31, %v56_v35  ;;  %v334_v22 = vmul.f32 1.442695, %v307_v27 }
 0x16e   :  { %v306_v16 = vsel %vm258_vm9, %v274_v39, %v290_v36  ;;  %v577_v10 = vmul.f32 -0.2, %v529_v48  ;;  %v2060_v29 = vpop.eup %2059  ;;  %vm262_vm12 = vcmp.gt.f32.partialorder %v2754_v5, 0.0  ;;  %2067 = vpow2.f32 %v616_v9 }
 0x16f   :  { %374 = vadd.xlane.f32.xlu1 %v2854_v46  ;;  %v332_v3 = vmul.f32 1.442695, %v306_v16  ;;  %vm544_vm13 = vcmp.gt.f32.partialorder %v528_v33, 0.0  ;;  %v560_v45 = vsub.f32 0.0, %v528_v33  ;;  %v2863_v52 = vmul.f32 %v2058_v15, %v59_v44  ;;  %v60_v15 = vld [vmem:[#allocation5 + $0x50] sm:$0xff] }
 0x170   :  { %372 = vadd.xlane.f32.xlu0 %v2857_v26  ;;  %2069 = vpow2.f32 %v334_v22  ;;  %v593_v35 = vsel %vm545_vm11, %v561_v8, %v577_v10  ;;  %v576_v34 = vmul.f32 -0.2, %v528_v33  ;;  %v2866_v53 = vmul.f32 %v2060_v29, %v58_v56 }
 0x171   :  { %2071 = vpow2.f32 %v332_v3  ;;  %v622_v38 = vmul.f32 1.442695, %v593_v35  ;;  %v245_v43 = vadd.f32 %v2745_v61, %v2738_v51  ;;  %v2062_v28 = vpop.eup %2061  ;;  %v244_v12 = vadd.f32 %v2745_v61, %v2736_v49 }
 0x172   :  { %v592_v31 = vsel %vm544_vm13, %v560_v45, %v576_v34  ;;  %v531_v39 = vadd.f32 %v2748_v2, %v2742_v57  ;;  %v530_v48 = vadd.f32 %v2748_v2, %v2740_v55  ;;  %v2878_v61 = vmul.f32 %v2062_v28, %v59_v44  ;;  %v61_v57 = vld [vmem:[#allocation5 + $0x58] sm:$0xff] }
 0x173   :  { %662 = vadd.xlane.f32.xlu1 %v2863_v52  ;;  %2073 = vpow2.f32 %v622_v38  ;;  %v620_v33 = vmul.f32 1.442695, %v592_v31  ;;  %vm261_vm14 = vcmp.gt.f32.partialorder %v245_v43, 0.0  ;;  %v277_v36 = vsub.f32 0.0, %v245_v43 }
 0x174   :  { %v2064_v9 = vpop.eup %2063  ;;  %660 = vadd.xlane.f32.xlu0 %v2866_v53  ;;  %v293_v51 = vmul.f32 -0.2, %v245_v43  ;;  %vm260_vm15 = vcmp.gt.f32.partialorder %v244_v12, 0.0  ;;  %v276_v27 = vsub.f32 0.0, %v244_v12  ;;  %v292_v8 = vmul.f32 -0.2, %v244_v12 }
 0x175   :  { %v2066_v49 = vpop.eup %2065  ;;  %2075 = vpow2.f32 %v620_v33  ;;  %vm547_vm1 = vcmp.gt.f32.partialorder %v531_v39, 0.0  ;;  %v563_v55 = vsub.f32 0.0, %v531_v39  ;;  %v2880_v2 = vmul.f32 %v2064_v9, %v58_v56 }
 0x176   :  { %v309_v22 = vsel %vm261_vm14, %v277_v36, %v293_v51  ;;  %v308_v16 = vsel %vm260_vm15, %v276_v27, %v292_v8  ;;  %v579_v10 = vmul.f32 -0.2, %v531_v39  ;;  %vm546_vm2 = vcmp.gt.f32.partialorder %v530_v48, 0.0  ;;  %v63_v27 = vld [vmem:[#allocation5 + $0x68] sm:$0xff] }
 0x177   :  { %378 = vadd.xlane.f32.xlu1 %v2878_v61  ;;  %v338_v29 = vmul.f32 1.442695, %v309_v22  ;;  %v336_v3 = vmul.f32 1.442695, %v308_v16  ;;  %v562_v45 = vsub.f32 0.0, %v530_v48  ;;  %v3434_v44 = vsub.f32 0.0, %v2757_v21 }
 0x178   :  { %376 = vadd.xlane.f32.xlu0 %v2880_v2  ;;  %v2890_v56 = vmul.f32 %v2066_v49, %v61_v57  ;;  %v595_v34 = vsel %vm547_vm1, %v563_v55, %v579_v10  ;;  %v578_v38 = vmul.f32 -0.2, %v530_v48  ;;  %v2068_v43 = vpop.eup %2067  ;;  %v435_v31 = vpack.c.bf16 %v2586_v62, %v2581_v60  ;;  %v3436_v55 = vld [vmem:[#allocation17_spill] sm:$0xff]  ;;  %v3438_v22 = vld [vmem:[#allocation19_spill] sm:$0xff] }
 0x179   :  { %v311_v35 = vsel %vm263_vm10, %v3434_v44, %v2826_v18  ;;  %2077 = vpow2.f32 %v338_v29  ;;  %v626_v28 = vmul.f32 1.442695, %v595_v34  ;;  %v720_v12 = vpack.c.bf16 %v2597_v6, %v2592_v4  ;;  %v65_v29 = vld [vmem:[#allocation5 + $0x78] sm:$0xff]  ;;  %v3439_v44 = vld [vmem:[#allocation21_spill] sm:$0xff] }
 0x17a   :  { %v2070_v39 = vpop.eup %2069  ;;  %v3435_v21 = vsub.f32 0.0, %v2754_v5  ;;  %v2901_v33 = vmul.f32 %v2068_v43, %v60_v15  ;;  %2079 = vpow2.f32 %v336_v3  ;;  %v594_v36 = vsel %vm546_vm2, %v562_v45, %v578_v38  ;;  %1745 = vmatpush3.bf16.msra.mxu1 %v435_v31  ;;  %v64_v45 = vld [vmem:[#allocation5 + $0x70] sm:$0xff] }
 0x17b   :  { %v2072_v9 = vpop.eup %2071  ;;  %666 = vadd.xlane.f32.xlu1 %v2890_v56  ;;  %v624_v51 = vmul.f32 1.442695, %v594_v36  ;;  %v436_v60 = vpack.c.bf16 %v2607_v14, %v2602_v11  ;;  %v342_v62 = vmul.f32 1.442695, %v311_v35  ;;  %2081 = vpow2.f32 %v626_v28  ;;  %1746 = vmatprep.subr.bf16.mxu1 %v720_v12  ;;  %v62_v11 = vld [vmem:[#allocation5 + $0x60] sm:$0xff] }
 0x17c   :  { %v310_v18 = vsel %vm262_vm12, %v3435_v21, %v2764_v24  ;;  %664 = vadd.xlane.f32.xlu0 %v2901_v33  ;;  %v721_v4 = vpack.c.bf16 %v2618_v32, %v2613_v30  ;;  %v2910_v24 = vmul.f32 %v2070_v39, %v61_v57  ;;  %v2912_v48 = vmul.f32 %v2072_v9, %v60_v15 }
 0x17d   :  { %v2074_v6 = vpop.eup %2073  ;;  %v340_v5 = vmul.f32 1.442695, %v310_v18  ;;  %2083 = vpow2.f32 %v624_v51  ;;  %v437_v14 = vpack.c.bf16 %v2628_v41, %v2623_v37  ;;  %v722_v30 = vpack.c.bf16 %v2639_v50, %v2634_v47  ;;  %v3437_v41 = vld [vmem:[#allocation18_spill] sm:$0xff] }
 0x17e   :  { %1747 = vmatpush3.bf16.msra.mxu1 %v436_v60  ;;  %2085 = vpow2.f32 %v342_v62  ;;  %v2920_v32 = vmul.f32 %v2074_v6, %v63_v27  ;;  %v438_v15 = vpack.c.bf16 %v3436_v55, %v2644_v54  ;;  %v723_v16 = vpack.c.bf16 %v3438_v22, %v3437_v41  ;;  %v3440_v54 = vld [vmem:[#allocation22_spill] sm:$0xff] }
 0x17f   :  { %v2076_v8 = vpop.eup %2075  ;;  %382 = vadd.xlane.f32.xlu1 %v2910_v24  ;;  %1748 = vmatprep.subr.bf16.mxu1 %v721_v4  ;;  %2087 = vpow2.f32 %v340_v5  ;;  %v439_v35 = vpack.c.bf16 %v3440_v54, %v3439_v44  ;;  %v3441_v31 = vmov 0.0|0.0  }
 0x180   :  { %380 = vadd.xlane.f32.xlu0 %v2912_v48  ;;  %v2922_v49 = vmul.f32 %v2076_v8, %v62_v11 }
 0x182   :  { %1749 = vmatpush3.bf16.msra.mxu1 %v437_v14 }
 0x183   :  { %v2078_v57 = vpop.eup %2077  ;;  %670 = vadd.xlane.f32.xlu1 %v2920_v32  ;;  %1750 = vmatprep.subr.bf16.mxu1 %v722_v30 }
 0x184   :  { %v2080_v37 = vpop.eup %2079  ;;  %668 = vadd.xlane.f32.xlu0 %v2922_v49  ;;  %v2930_v47 = vmul.f32 %v2078_v57, %v63_v27 }
 0x185   :  { %v2082_v50 = vpop.eup %2081  ;;  %v2932_v10 = vmul.f32 %v2080_v37, %v62_v11 }
 0x186   :  { %1751 = vmatpush3.bf16.msra.mxu1 %v438_v15  ;;  %v2938_v34 = vmul.f32 %v2082_v50, %v65_v29 }
 0x187   :  { %v2084_v3 = vpop.eup %2083  ;;  %386 = vadd.xlane.f32.xlu1 %v2930_v47  ;;  %1752 = vmatprep.subr.bf16.mxu1 %v723_v16 }
 0x188   :  { %384 = vadd.xlane.f32.xlu0 %v2932_v10  ;;  %v2086_v38 = vpop.eup %2085  ;;  %v2940_v43 = vmul.f32 %v2084_v3, %v64_v45 }
 0x189   :  { %v2088_v28 = vpop.eup %2087  ;;  %v2945_v12 = vmul.f32 %v2086_v38, %v65_v29 }
 0x18a   :  { %1753 = vmatpush3.bf16.msra.mxu1 %v439_v35  ;;  %v2947_v39 = vmul.f32 %v2088_v28, %v64_v45 }
 0x18b   :  { %674 = vadd.xlane.f32.xlu1 %v2938_v34  ;;  %1977 = vmatprep.subr.bf16.mxu1 %v3441_v31 }
 0x18c   :  { %672 = vadd.xlane.f32.xlu0 %v2940_v43 }
 0x18f   :  { %390 = vadd.xlane.f32.xlu1 %v2945_v12 }
 0x190   :  { %388 = vadd.xlane.f32.xlu0 %v2947_v39 }
 0x1e0   :  { %v647_v21 = vpop.xlane.xlu1 %646 }
 0x1e1   :  { %2089 = vrcp.f32 %v647_v21  ;;  %v645_v18 = vpop.xlane.xlu0 %644 }
 0x1e2   :  { %2091 = vrcp.f32 %v645_v18 }
 0x1e4   :  { %v363_v36 = vpop.xlane.xlu1 %362 }
 0x1e5   :  { %2093 = vrcp.f32 %v363_v36  ;;  %v361_v9 = vpop.xlane.xlu0 %360 }
 0x1e6   :  { %2095 = vrcp.f32 %v361_v9 }
 0x1e8   :  { %v651_v51 = vpop.xlane.xlu1 %650 }
 0x1e9   :  { %2097 = vrcp.f32 %v651_v51  ;;  %v649_v60 = vpop.xlane.xlu0 %648 }
 0x1ea   :  { %2099 = vrcp.f32 %v649_v60 }
 0x1eb   :  { %v2090_v62 = vpop.eup %2089 }
 0x1ec   :  { %v2092_v4 = vpop.eup %2091  ;;  %v367_v6 = vpop.xlane.xlu1 %366  ;;  %v693_v5 = vmul.f32 %v2090_v62, %v2781_v20 }
 0x1ed   :  { %2101 = vrcp.f32 %v367_v6  ;;  %v365_v27 = vpop.xlane.xlu0 %364  ;;  %v692_v8 = vmul.f32 %v2092_v4, %v2784_v63 }
 0x1ee   :  { %2103 = vrcp.f32 %v365_v27 }
 0x1ef   :  { %v2094_v11 = vpop.eup %2093  ;;  %v708_v14 = vpack.c.bf16 %v693_v5, %v692_v8 }
 0x1f0   :  { %v2096_v30 = vpop.eup %2095  ;;  %v655_v57 = vpop.xlane.xlu1 %654  ;;  %v409_v55 = vmul.f32 %v2094_v11, %v2787_v59 }
 0x1f1   :  { %2105 = vrcp.f32 %v655_v57  ;;  %756 = vmatprep.mubr.bf16.mxu1 %v708_v14  ;;  %v653_v15 = vpop.xlane.xlu0 %652  ;;  %v408_v37 = vmul.f32 %v2096_v30, %v2790_v42 }
 0x1f2   :  { %2107 = vrcp.f32 %v653_v15 }
 0x1f3   :  { %v2098_v41 = vpop.eup %2097  ;;  %v424_v22 = vpack.c.bf16 %v409_v55, %v408_v37 }
 0x1f4   :  { %v2100_v20 = vpop.eup %2099  ;;  %v371_v16 = vpop.xlane.xlu1 %370  ;;  %v695_v50 = vmul.f32 %v2098_v41, %v2795_v19 }
 0x1f5   :  { %2109 = vrcp.f32 %v371_v16  ;;  %757 = vmatmul.mubr.bf16.vlgmr.msra.gmra.mrb[0].mxu1 %v424_v22  ;;  %v369_v63 = vpop.xlane.xlu0 %368  ;;  %v694_v29 = vmul.f32 %v2100_v20, %v2800_v23 }
 0x1f6   :  { %2111 = vrcp.f32 %v369_v63 }
 0x1f7   :  { %v2102_v3 = vpop.eup %2101  ;;  %v709_v59 = vpack.c.bf16 %v695_v50, %v694_v29 }
 0x1f8   :  { %v2104_v45 = vpop.eup %2103  ;;  %v659_v44 = vpop.xlane.xlu1 %658  ;;  %v411_v54 = vmul.f32 %v2102_v3, %v2812_v17 }
 0x1f9   :  { %2113 = vrcp.f32 %v659_v44  ;;  %764 = vmatprep.mubr.bf16.mxu1 %v709_v59  ;;  %v657_v42 = vpop.xlane.xlu0 %656  ;;  %v410_v35 = vmul.f32 %v2104_v45, %v2815_v58 }
 0x1fa   :  { %2115 = vrcp.f32 %v657_v42 }
 0x1fb   :  { %v2106_v38 = vpop.eup %2105  ;;  %v425_v19 = vpack.c.bf16 %v411_v54, %v410_v35 }
 0x1fc   :  { %v2108_v28 = vpop.eup %2107  ;;  %v375_v21 = vpop.xlane.xlu1 %374  ;;  %v697_v18 = vmul.f32 %v2106_v38, %v2817_v7 }
 0x1fd   :  { %2117 = vrcp.f32 %v375_v21  ;;  %765 = vmatmul.mubr.bf16.gmra.mrb[4].mxu1 %v425_v19  ;;  %v373_v23 = vpop.xlane.xlu0 %372  ;;  %v696_v36 = vmul.f32 %v2108_v28, %v2820_v13 }
 0x1fe   :  { %2119 = vrcp.f32 %v373_v23 }
 0x1ff   :  { %v2110_v9 = vpop.eup %2109  ;;  %v710_v17 = vpack.c.bf16 %v697_v18, %v696_v36 }
 0x200   :  { %v2112_v51 = vpop.eup %2111  ;;  %v663_v60 = vpop.xlane.xlu1 %662  ;;  %v413_v62 = vmul.f32 %v2110_v9, %v2832_v1 }
 0x201   :  { %2121 = vrcp.f32 %v663_v60  ;;  %772 = vmatprep.mubr.bf16.mxu1 %v710_v17  ;;  %v661_v58 = vpop.xlane.xlu0 %660  ;;  %v412_v4 = vmul.f32 %v2112_v51, %v2834_v25 }
 0x202   :  { %2123 = vrcp.f32 %v661_v58 }
 0x203   :  { %v2114_v6 = vpop.eup %2113  ;;  %v426_v7 = vpack.c.bf16 %v413_v62, %v412_v4 }
 0x204   :  { %v2116_v5 = vpop.eup %2115  ;;  %v379_v27 = vpop.xlane.xlu1 %378  ;;  %v699_v8 = vmul.f32 %v2114_v6, %v2836_v0 }
 0x205   :  { %2125 = vrcp.f32 %v379_v27  ;;  %773 = vmatmul.mubr.bf16.gmra.mrb[8].mxu1 %v426_v7  ;;  %v377_v13 = vpop.xlane.xlu0 %376  ;;  %v698_v11 = vmul.f32 %v2116_v5, %v2850_v40 }
 0x206   :  { %2127 = vrcp.f32 %v377_v13 }
 0x207   :  { %v2118_v14 = vpop.eup %2117  ;;  %v711_v1 = vpack.c.bf16 %v699_v8, %v698_v11 }
 0x208   :  { %v2120_v30 = vpop.eup %2119  ;;  %v667_v57 = vpop.xlane.xlu1 %666  ;;  %v415_v55 = vmul.f32 %v2118_v14, %v2854_v46  ;;  %v3442_v14 = vmov 0.0  }
 0x209   :  { %2129 = vrcp.f32 %v667_v57  ;;  %780 = vmatprep.mubr.bf16.mxu1 %v711_v1  ;;  %v665_v25 = vpop.xlane.xlu0 %664  ;;  %v414_v15 = vmul.f32 %v2120_v30, %v2857_v26 }
 0x20a   :  { %2131 = vrcp.f32 %v665_v25 }
 0x20b   :  { %v2122_v37 = vpop.eup %2121  ;;  %v427_v0 = vpack.c.bf16 %v415_v55, %v414_v15 }
 0x20c   :  { %v2124_v41 = vpop.eup %2123  ;;  %v383_v22 = vpop.xlane.xlu1 %382  ;;  %v701_v20 = vmul.f32 %v2122_v37, %v2863_v52 }
 0x20d   :  { %2133 = vrcp.f32 %v383_v22  ;;  %781 = vmatmul.mubr.bf16.gmra.mrb[12].mxu1 %v427_v0  ;;  %v381_v40 = vpop.xlane.xlu0 %380  ;;  %v700_v16 = vmul.f32 %v2124_v41, %v2866_v53 }
 0x20e   :  { %2135 = vrcp.f32 %v381_v40 }
 0x20f   :  { %v2126_v50 = vpop.eup %2125  ;;  %v712_v46 = vpack.c.bf16 %v701_v20, %v700_v16 }
 0x210   :  { %v2128_v63 = vpop.eup %2127  ;;  %v671_v29 = vpop.xlane.xlu1 %670  ;;  %v417_v3 = vmul.f32 %v2126_v50, %v2878_v61 }
 0x211   :  { %2137 = vrcp.f32 %v671_v29  ;;  %788 = vmatprep.mubr.bf16.mxu1 %v712_v46  ;;  %v669_v26 = vpop.xlane.xlu0 %668  ;;  %v416_v59 = vmul.f32 %v2128_v63, %v2880_v2 }
 0x212   :  { %2139 = vrcp.f32 %v669_v26 }
 0x213   :  { %v2130_v45 = vpop.eup %2129  ;;  %v428_v52 = vpack.c.bf16 %v417_v3, %v416_v59 }
 0x214   :  { %v2132_v44 = vpop.eup %2131  ;;  %v387_v54 = vpop.xlane.xlu1 %386  ;;  %v703_v42 = vmul.f32 %v2130_v45, %v2890_v56 }
 0x215   :  { %2141 = vrcp.f32 %v387_v54  ;;  %789 = vmatmul.mubr.bf16.gmra.mrb[16].mxu1 %v428_v52  ;;  %v385_v53 = vpop.xlane.xlu0 %384  ;;  %v702_v35 = vmul.f32 %v2132_v44, %v2901_v33 }
 0x216   :  { %2143 = vrcp.f32 %v385_v53 }
 0x217   :  { %v2134_v38 = vpop.eup %2133  ;;  %v713_v61 = vpack.c.bf16 %v703_v42, %v702_v35 }
 0x218   :  { %v2136_v19 = vpop.eup %2135  ;;  %v675_v28 = vpop.xlane.xlu1 %674  ;;  %v419_v21 = vmul.f32 %v2134_v38, %v2910_v24  ;;  %v3443_v38 = vld [vmem:[#allocation13_spill] sm:$0xff] }
 0x219   :  { %2145 = vrcp.f32 %v675_v28  ;;  %796 = vmatprep.mubr.bf16.mxu1 %v713_v61  ;;  %v673_v2 = vpop.xlane.xlu0 %672  ;;  %v418_v18 = vmul.f32 %v2136_v19, %v2912_v48 }
 0x21a   :  { %2147 = vrcp.f32 %v673_v2  ;;  %v3444_v2 = vld [vmem:[#allocation15_spill] sm:$0xff] }
 0x21b   :  { %v2138_v23 = vpop.eup %2137  ;;  %v429_v56 = vpack.c.bf16 %v419_v21, %v418_v18 }
 0x21c   :  { %v2140_v36 = vpop.eup %2139  ;;  %v391_v9 = vpop.xlane.xlu1 %390  ;;  %v705_v17 = vmul.f32 %v2138_v23, %v2920_v32 }
 0x21d   :  { %2149 = vrcp.f32 %v391_v9  ;;  %797 = vmatmul.mubr.bf16.gmra.mrb[20].mxu1 %v429_v56  ;;  %v389_v33 = vpop.xlane.xlu0 %388  ;;  %v704_v51 = vmul.f32 %v2140_v36, %v2922_v49 }
 0x21e   :  { %2151 = vrcp.f32 %v389_v33 }
 0x21f   :  { %v2142_v60 = vpop.eup %2141  ;;  %v714_v24 = vpack.c.bf16 %v705_v17, %v704_v51  ;;  %v3445_v17 = vld [vmem:[#allocation16_spill] sm:$0xff] }
 0x220   :  { %v2144_v62 = vpop.eup %2143  ;;  %v421_v58 = vmul.f32 %v2142_v60, %v2930_v47 }
 0x221   :  { %804 = vmatprep.mubr.bf16.mxu1 %v714_v24  ;;  %v420_v48 = vmul.f32 %v2144_v62, %v2932_v10  ;;  %v3446_v24 = vld [vmem:[#allocation14_spill] sm:$0xff] }
 0x223   :  { %v2146_v4 = vpop.eup %2145  ;;  %v430_v6 = vpack.c.bf16 %v421_v58, %v420_v48 }
 0x224   :  { %v2148_v7 = vpop.eup %2147  ;;  %v707_v5 = vmul.f32 %v2146_v4, %v2938_v34 }
 0x225   :  { %805 = vmatmul.mubr.bf16.gmra.mrb[24].mxu1 %v430_v6  ;;  %v706_v32 = vmul.f32 %v2148_v7, %v2940_v43 }
 0x227   :  { %v2150_v27 = vpop.eup %2149  ;;  %v715_v8 = vpack.c.bf16 %v707_v5, %v706_v32 }
 0x228   :  { %v2152_v49 = vpop.eup %2151  ;;  %v423_v13 = vmul.f32 %v2150_v27, %v2945_v12 }
 0x229   :  { %812 = vmatprep.mubr.bf16.mxu1 %v715_v8  ;;  %v422_v11 = vmul.f32 %v2152_v49, %v2947_v39 }
 0x22b   :  { %v431_v47 = vpack.c.bf16 %v423_v13, %v422_v11 }
 0x22d   :  { %813 = vmatmul.mubr.bf16.gmra.mrb[28].mxu1 %v431_v47 }
 0x22e   :  { %1950 = vmatprep.mubr.msk.f32.mxu1 %vm2406_vm0, %v3442_v14 }
 0x2c8   :  { %v1754_v10 = vpop.f32.mrb[0].mxu1 }
 0x2c9   :  { %v1755_v1 = vpop.f32.mrb[1].mxu1 }
 0x2ca   :  { %v1756_v30 = vadd.f32 %v1755_v1, %v1754_v10  ;;  %v1757_v34 = vpop.f32.mrb[2].mxu1 }
 0x2cb   :  { %v1758_v57 = vpop.f32.mrb[3].mxu1 }
 0x2cc   :  { %v821_v55 = vmul.f32 0.5, %v1756_v30  ;;  %v1759_v43 = vadd.f32 %v1758_v57, %v1757_v34 }
 0x2ce   :  { %v853_v25 = vmul.f32 1.442695, %v821_v55  ;;  %v822_v15 = vmul.f32 0.5, %v1759_v43  ;;  %vm837_vm0 = vcmp.gt.f32.partialorder %v821_v55, 0.0 }
 0x2d0   :  { %2153 = vpow2.f32 %v853_v25  ;;  %v855_v37 = vmul.f32 1.442695, %v822_v15  ;;  %v1760_v12 = vpop.f32.mrb[4].mxu1  ;;  %vm838_vm3 = vcmp.gt.f32.partialorder %v822_v15, 0.0 }
 0x2d1   :  { %v1761_v0 = vpop.f32.mrb[5].mxu1 }
 0x2d2   :  { %2155 = vpow2.f32 %v855_v37  ;;  %v1762_v39 = vadd.f32 %v1761_v0, %v1760_v12  ;;  %v1763_v41 = vpop.f32.mrb[6].mxu1 }
 0x2d3   :  { %v1764_v22 = vpop.f32.mrb[7].mxu1 }
 0x2d4   :  { %v823_v20 = vmul.f32 0.5, %v1762_v39  ;;  %v1765_v40 = vadd.f32 %v1764_v22, %v1763_v41 }
 0x2d6   :  { %v857_v16 = vmul.f32 1.442695, %v823_v20  ;;  %v824_v50 = vmul.f32 0.5, %v1765_v40  ;;  %vm839_vm4 = vcmp.gt.f32.partialorder %v823_v20, 0.0 }
 0x2d8   :  { %2157 = vpow2.f32 %v857_v16  ;;  %v859_v46 = vmul.f32 1.442695, %v824_v50  ;;  %v1766_v63 = vpop.f32.mrb[8].mxu1  ;;  %vm840_vm5 = vcmp.gt.f32.partialorder %v824_v50, 0.0 }
 0x2d9   :  { %v1767_v29 = vpop.f32.mrb[9].mxu1 }
 0x2da   :  { %v2154_v3 = vpop.eup %2153  ;;  %2159 = vpow2.f32 %v859_v46  ;;  %v1768_v26 = vadd.f32 %v1767_v29, %v1766_v63  ;;  %v1769_v59 = vpop.f32.mrb[10].mxu1 }
 0x2db   :  { %v1705_v45 = vadd.f32 -1.0, %v2154_v3  ;;  %v1770_v52 = vpop.f32.mrb[11].mxu1 }
 0x2dc   :  { %v2156_v44 = vpop.eup %2155  ;;  %v2985_v54 = vmul.f32 0.5, %v1768_v26  ;;  %v1771_v42 = vadd.f32 %v1770_v52, %v1769_v59 }
 0x2dd   :  { %v901_v53 = vsel %vm837_vm0, %v821_v55, %v1705_v45  ;;  %v1706_v35 = vadd.f32 -1.0, %v2156_v44 }
 0x2de   :  { %v994_v61 = vmul.f32 %v3443_v38, %v901_v53  ;;  %v861_v19 = vmul.f32 1.442695, %v2985_v54  ;;  %v2989_v28 = vmul.f32 0.5, %v1771_v42  ;;  %v1278_v18 = vmul.f32 %v3444_v2, %v901_v53 }
 0x2df   :  { %v902_v21 = vsel %vm838_vm3, %v822_v15, %v1706_v35  ;;  %vm841_vm6 = vcmp.gt.f32.partialorder %v2985_v54, 0.0 }
 0x2e0   :  { %v995_v23 = vmul.f32 %v3443_v38, %v902_v21  ;;  %2161 = vpow2.f32 %v861_v19  ;;  %v863_v56 = vmul.f32 1.442695, %v2989_v28  ;;  %v1772_v36 = vpop.f32.mrb[12].mxu1  ;;  %v1298_v33 = vmul.f32 %v3445_v17, %v1278_v18 }
 0x2e1   :  { %v1773_v9 = vpop.f32.mrb[13].mxu1  ;;  %v1978_v51 = vpack.c.bf16 %v902_v21, %v901_v53  ;;  %v1279_v60 = vmul.f32 %v3444_v2, %v902_v21  ;;  %v1014_v62 = vmul.f32 %v3446_v24, %v994_v61  ;;  %vm842_vm7 = vcmp.gt.f32.partialorder %v2989_v28, 0.0 }
 0x2e2   :  { %v2158_v58 = vpop.eup %2157  ;;  %2163 = vpow2.f32 %v863_v56  ;;  %v1774_v48 = vadd.f32 %v1773_v9, %v1772_v36  ;;  %v1775_v4 = vpop.f32.mrb[14].mxu1  ;;  %v2997_v6 = vpack.c.bf16 %v995_v23, %v994_v61  ;;  %v1015_v7 = vmul.f32 %v3446_v24, %v995_v23  ;;  %1314 = vadd.xlane.f32.xlu0 %v1298_v33 }
 0x2e3   :  { %v1707_v5 = vadd.f32 -1.0, %v2158_v58  ;;  %1979 = vmatpush3.bf16.xpose.msra.mxu1 %v1978_v51  ;;  %v1776_v32 = vpop.f32.mrb[15].mxu1  ;;  %v1299_v27 = vmul.f32 %v3445_v17, %v1279_v60  ;;  %v3001_v8 = vpack.c.bf16 %v1279_v60, %v1278_v18 }
 0x2e4   :  { %v2160_v49 = vpop.eup %2159  ;;  %v3003_v13 = vmul.f32 0.5, %v1774_v48  ;;  %v1777_v11 = vadd.f32 %v1776_v32, %v1775_v4  ;;  %1980 = vmatprep.subr.bf16.mxu1 %v3441_v31 }
 0x2e5   :  { %v903_v47 = vsel %vm839_vm4, %v823_v20, %v1707_v5  ;;  %v1708_v14 = vadd.f32 -1.0, %v2160_v49  ;;  %1316 = vadd.xlane.f32.xlu1 %v1299_v27  ;;  %1819 = vmatprep.subr.bf16.mxu0 %v3001_v8 }
 0x2e6   :  { %v996_v10 = vmul.f32 %v3443_v38, %v903_v47  ;;  %v865_v1 = vmul.f32 1.442695, %v3003_v13  ;;  %v3009_v30 = vmul.f32 0.5, %v1777_v11  ;;  %1820 = vmatpush3.bf16.msra.mxu0 %v2997_v6  ;;  %1030 = vadd.xlane.f32.xlu0 %v1014_v62  ;;  %v1280_v57 = vmul.f32 %v3444_v2, %v903_v47 }
 0x2e7   :  { %v904_v34 = vsel %vm840_vm5, %v824_v50, %v1708_v14  ;;  %vm843_vm8 = vcmp.gt.f32.partialorder %v3003_v13, 0.0 }
 0x2e8   :  { %v997_v55 = vmul.f32 %v3443_v38, %v904_v34  ;;  %2165 = vpow2.f32 %v865_v1  ;;  %v867_v43 = vmul.f32 1.442695, %v3009_v30  ;;  %v1778_v25 = vpop.f32.mrb[16].mxu1  ;;  %v1300_v37 = vmul.f32 %v3445_v17, %v1280_v57 }
 0x2e9   :  { %1032 = vadd.xlane.f32.xlu1 %v1015_v7  ;;  %v1779_v15 = vpop.f32.mrb[17].mxu1  ;;  %v1981_v12 = vpack.c.bf16 %v904_v34, %v903_v47  ;;  %v1281_v0 = vmul.f32 %v3444_v2, %v904_v34  ;;  %v1016_v39 = vmul.f32 %v3446_v24, %v996_v10  ;;  %vm844_vm9 = vcmp.gt.f32.partialorder %v3009_v30, 0.0 }
 0x2ea   :  { %v2162_v41 = vpop.eup %2161  ;;  %2167 = vpow2.f32 %v867_v43  ;;  %v1780_v22 = vadd.f32 %v1779_v15, %v1778_v25  ;;  %v1781_v20 = vpop.f32.mrb[18].mxu1  ;;  %v3018_v40 = vpack.c.bf16 %v997_v55, %v996_v10  ;;  %v1017_v16 = vmul.f32 %v3446_v24, %v997_v55  ;;  %1318 = vadd.xlane.f32.xlu0 %v1300_v37 }
 0x2eb   :  { %v1709_v50 = vadd.f32 -1.0, %v2162_v41  ;;  %1982 = vmatpush3.bf16.xpose.msra.mxu1 %v1981_v12  ;;  %v1782_v46 = vpop.f32.mrb[19].mxu1  ;;  %v1301_v63 = vmul.f32 %v3445_v17, %v1281_v0  ;;  %v3022_v29 = vpack.c.bf16 %v1281_v0, %v1280_v57 }
 0x2ec   :  { %v2164_v3 = vpop.eup %2163  ;;  %v3025_v26 = vmul.f32 0.5, %v1780_v22  ;;  %v1783_v59 = vadd.f32 %v1782_v46, %v1781_v20  ;;  %1983 = vmatprep.subr.bf16.mxu1 %v3441_v31 }
 0x2ed   :  { %v905_v45 = vsel %vm841_vm6, %v2985_v54, %v1709_v50  ;;  %v1710_v52 = vadd.f32 -1.0, %v2164_v3  ;;  %1320 = vadd.xlane.f32.xlu1 %v1301_v63  ;;  %1821 = vmatprep.subr.bf16.mxu0 %v3022_v29 }
 0x2ee   :  { %v998_v44 = vmul.f32 %v3443_v38, %v905_v45  ;;  %v869_v42 = vmul.f32 1.442695, %v3025_v26  ;;  %v3033_v53 = vmul.f32 0.5, %v1783_v59  ;;  %1822 = vmatpush3.bf16.msra.mxu0 %v3018_v40  ;;  %1034 = vadd.xlane.f32.xlu0 %v1016_v39  ;;  %v1282_v61 = vmul.f32 %v3444_v2, %v905_v45 }
 0x2ef   :  { %v906_v35 = vsel %vm842_vm7, %v2989_v28, %v1710_v52  ;;  %vm845_vm10 = vcmp.gt.f32.partialorder %v3025_v26, 0.0 }
 0x2f0   :  { %v999_v54 = vmul.f32 %v3443_v38, %v906_v35  ;;  %2169 = vpow2.f32 %v869_v42  ;;  %v871_v19 = vmul.f32 1.442695, %v3033_v53  ;;  %v1784_v21 = vpop.f32.mrb[20].mxu1  ;;  %v1302_v23 = vmul.f32 %v3445_v17, %v1282_v61 }
 0x2f1   :  { %1036 = vadd.xlane.f32.xlu1 %v1017_v16  ;;  %v1785_v18 = vpop.f32.mrb[21].mxu1  ;;  %v1984_v56 = vpack.c.bf16 %v906_v35, %v905_v45  ;;  %v1283_v36 = vmul.f32 %v3444_v2, %v906_v35  ;;  %v1018_v9 = vmul.f32 %v3446_v24, %v998_v44  ;;  %vm846_vm11 = vcmp.gt.f32.partialorder %v3033_v53, 0.0 }
 0x2f2   :  { %v2166_v33 = vpop.eup %2165  ;;  %2171 = vpow2.f32 %v871_v19  ;;  %v1786_v28 = vadd.f32 %v1785_v18, %v1784_v21  ;;  %v1787_v51 = vpop.f32.mrb[22].mxu1  ;;  %v3043_v60 = vpack.c.bf16 %v999_v54, %v998_v44  ;;  %v1019_v62 = vmul.f32 %v3446_v24, %v999_v54  ;;  %1322 = vadd.xlane.f32.xlu0 %v1302_v23 }
 0x2f3   :  { %v1711_v58 = vadd.f32 -1.0, %v2166_v33  ;;  %1985 = vmatpush3.bf16.xpose.msra.mxu1 %v1984_v56  ;;  %v1788_v48 = vpop.f32.mrb[23].mxu1  ;;  %v1303_v4 = vmul.f32 %v3445_v17, %v1283_v36  ;;  %v3047_v7 = vpack.c.bf16 %v1283_v36, %v1282_v61 }
 0x2f4   :  { %v2168_v5 = vpop.eup %2167  ;;  %v3050_v32 = vmul.f32 0.5, %v1786_v28  ;;  %v1789_v27 = vadd.f32 %v1788_v48, %v1787_v51  ;;  %1986 = vmatprep.subr.bf16.mxu1 %v3441_v31 }
 0x2f5   :  { %v907_v49 = vsel %vm843_vm8, %v3003_v13, %v1711_v58  ;;  %v1712_v11 = vadd.f32 -1.0, %v2168_v5  ;;  %1324 = vadd.xlane.f32.xlu1 %v1303_v4  ;;  %1823 = vmatprep.subr.bf16.mxu0 %v3047_v7 }
 0x2f6   :  { %v1000_v47 = vmul.f32 %v3443_v38, %v907_v49  ;;  %v873_v14 = vmul.f32 1.442695, %v3050_v32  ;;  %v3058_v10 = vmul.f32 0.5, %v1789_v27  ;;  %1824 = vmatpush3.bf16.msra.mxu0 %v3043_v60  ;;  %1038 = vadd.xlane.f32.xlu0 %v1018_v9  ;;  %v1284_v34 = vmul.f32 %v3444_v2, %v907_v49 }
 0x2f7   :  { %v908_v1 = vsel %vm844_vm9, %v3009_v30, %v1712_v11  ;;  %vm847_vm12 = vcmp.gt.f32.partialorder %v3050_v32, 0.0 }
 0x2f8   :  { %v1001_v13 = vmul.f32 %v3443_v38, %v908_v1  ;;  %2173 = vpow2.f32 %v873_v14  ;;  %v875_v57 = vmul.f32 1.442695, %v3058_v10  ;;  %v1790_v55 = vpop.f32.mrb[24].mxu1  ;;  %v1304_v25 = vmul.f32 %v3445_v17, %v1284_v34 }
 0x2f9   :  { %1040 = vadd.xlane.f32.xlu1 %v1019_v62  ;;  %v1791_v43 = vpop.f32.mrb[25].mxu1  ;;  %v1987_v15 = vpack.c.bf16 %v908_v1, %v907_v49  ;;  %v1285_v37 = vmul.f32 %v3444_v2, %v908_v1  ;;  %v1020_v12 = vmul.f32 %v3446_v24, %v1000_v47  ;;  %vm848_vm13 = vcmp.gt.f32.partialorder %v3058_v10, 0.0 }
 0x2fa   :  { %v2170_v0 = vpop.eup %2169  ;;  %2175 = vpow2.f32 %v875_v57  ;;  %v1792_v30 = vadd.f32 %v1791_v43, %v1790_v55  ;;  %v1793_v39 = vpop.f32.mrb[26].mxu1  ;;  %v3068_v41 = vpack.c.bf16 %v1001_v13, %v1000_v47  ;;  %v1021_v22 = vmul.f32 %v3446_v24, %v1001_v13  ;;  %1326 = vadd.xlane.f32.xlu0 %v1304_v25 }
 0x2fb   :  { %v1713_v20 = vadd.f32 -1.0, %v2170_v0  ;;  %1988 = vmatpush3.bf16.xpose.msra.mxu1 %v1987_v15  ;;  %v1794_v16 = vpop.f32.mrb[27].mxu1  ;;  %v1305_v50 = vmul.f32 %v3445_v17, %v1285_v37  ;;  %v3072_v46 = vpack.c.bf16 %v1285_v37, %v1284_v34 }
 0x2fc   :  { %v2172_v63 = vpop.eup %2171  ;;  %v3075_v3 = vmul.f32 0.5, %v1792_v30  ;;  %v1795_v59 = vadd.f32 %v1794_v16, %v1793_v39  ;;  %1989 = vmatprep.subr.bf16.mxu1 %v3441_v31 }
 0x2fd   :  { %v909_v45 = vsel %vm845_vm10, %v3025_v26, %v1713_v20  ;;  %v1714_v52 = vadd.f32 -1.0, %v2172_v63  ;;  %1328 = vadd.xlane.f32.xlu1 %v1305_v50  ;;  %1825 = vmatprep.subr.bf16.mxu0 %v3072_v46 }
 0x2fe   :  { %v1002_v44 = vmul.f32 %v3443_v38, %v909_v45  ;;  %v877_v42 = vmul.f32 1.442695, %v3075_v3  ;;  %v3083_v35 = vmul.f32 0.5, %v1795_v59  ;;  %1826 = vmatpush3.bf16.msra.mxu0 %v3068_v41  ;;  %1042 = vadd.xlane.f32.xlu0 %v1020_v12  ;;  %v1286_v54 = vmul.f32 %v3444_v2, %v909_v45 }
 0x2ff   :  { %v910_v61 = vsel %vm846_vm11, %v3033_v53, %v1714_v52  ;;  %vm849_vm14 = vcmp.gt.f32.partialorder %v3075_v3, 0.0 }
 0x300   :  { %v1003_v26 = vmul.f32 %v3443_v38, %v910_v61  ;;  %2177 = vpow2.f32 %v877_v42  ;;  %v879_v19 = vmul.f32 1.442695, %v3083_v35  ;;  %v1796_v21 = vpop.f32.mrb[28].mxu1  ;;  %v1306_v23 = vmul.f32 %v3445_v17, %v1286_v54 }
 0x301   :  { %1044 = vadd.xlane.f32.xlu1 %v1021_v22  ;;  %v1797_v18 = vpop.f32.mrb[29].mxu1  ;;  %v1990_v56 = vpack.c.bf16 %v910_v61, %v909_v45  ;;  %v1287_v36 = vmul.f32 %v3444_v2, %v910_v61  ;;  %v1022_v9 = vmul.f32 %v3446_v24, %v1002_v44  ;;  %vm850_vm15 = vcmp.gt.f32.partialorder %v3083_v35, 0.0 }
 0x302   :  { %v2174_v33 = vpop.eup %2173  ;;  %2179 = vpow2.f32 %v879_v19  ;;  %v1798_v53 = vadd.f32 %v1797_v18, %v1796_v21  ;;  %v1799_v28 = vpop.f32.mrb[30].mxu1  ;;  %v3093_v51 = vpack.c.bf16 %v1003_v26, %v1002_v44  ;;  %v1023_v62 = vmul.f32 %v3446_v24, %v1003_v26  ;;  %1330 = vadd.xlane.f32.xlu0 %v1306_v23 }
 0x303   :  { %v1715_v58 = vadd.f32 -1.0, %v2174_v33  ;;  %1991 = vmatpush3.bf16.xpose.msra.mxu1 %v1990_v56  ;;  %v1800_v48 = vpop.f32.mrb[31].mxu1  ;;  %v1307_v4 = vmul.f32 %v3445_v17, %v1287_v36  ;;  %v3097_v5 = vpack.c.bf16 %v1287_v36, %v1286_v54 }
 0x304   :  { %v2176_v27 = vpop.eup %2175  ;;  %v3100_v49 = vmul.f32 0.5, %v1798_v53  ;;  %v1801_v11 = vadd.f32 %v1800_v48, %v1799_v28  ;;  %1992 = vmatprep.subr.bf16.mxu1 %v3441_v31 }
 0x305   :  { %v911_v47 = vsel %vm847_vm12, %v3050_v32, %v1715_v58  ;;  %v1716_v14 = vadd.f32 -1.0, %v2176_v27  ;;  %1332 = vadd.xlane.f32.xlu1 %v1307_v4  ;;  %1827 = vmatprep.subr.bf16.mxu0 %v3097_v5 }
 0x306   :  { %v1004_v1 = vmul.f32 %v3443_v38, %v911_v47  ;;  %v881_v34 = vmul.f32 1.442695, %v3100_v49  ;;  %v836_v13 = vmul.f32 0.5, %v1801_v11  ;;  %1828 = vmatpush3.bf16.msra.mxu0 %v3093_v51  ;;  %1046 = vadd.xlane.f32.xlu0 %v1022_v9  ;;  %v1288_v55 = vmul.f32 %v3444_v2, %v911_v47 }
 0x307   :  { %v912_v57 = vsel %vm848_vm13, %v3058_v10, %v1716_v14  ;;  %vm851_vm1 = vcmp.gt.f32.partialorder %v3100_v49, 0.0 }
 0x308   :  { %v1005_v32 = vmul.f32 %v3443_v38, %v912_v57  ;;  %2181 = vpow2.f32 %v881_v34  ;;  %v883_v43 = vmul.f32 1.442695, %v836_v13  ;;  %v1308_v25 = vmul.f32 %v3445_v17, %v1288_v55 }
 0x309   :  { %1048 = vadd.xlane.f32.xlu1 %v1023_v62  ;;  %v1993_v15 = vpack.c.bf16 %v912_v57, %v911_v47  ;;  %v1289_v37 = vmul.f32 %v3444_v2, %v912_v57  ;;  %v1024_v12 = vmul.f32 %v3446_v24, %v1004_v1  ;;  %vm852_vm2 = vcmp.gt.f32.partialorder %v836_v13, 0.0  ;;  %v3448_v57 = vld [vmem:[#allocation11_spill] sm:$0xff] }
 0x30a   :  { %v2178_v0 = vpop.eup %2177  ;;  %2183 = vpow2.f32 %v883_v43  ;;  %v3115_v30 = vpack.c.bf16 %v1005_v32, %v1004_v1  ;;  %v1025_v10 = vmul.f32 %v3446_v24, %v1005_v32  ;;  %1334 = vadd.xlane.f32.xlu0 %v1308_v25  ;;  %v3449_v32 = vld [vmem:[#allocation12_spill] sm:$0xff] }
 0x30b   :  { %v1717_v39 = vadd.f32 -1.0, %v2178_v0  ;;  %1994 = vmatpush3.bf16.xpose.msra.mxu1 %v1993_v15  ;;  %v1309_v22 = vmul.f32 %v3445_v17, %v1289_v37  ;;  %v3119_v20 = vpack.c.bf16 %v1289_v37, %v1288_v55 }
 0x30c   :  { %v2180_v16 = vpop.eup %2179  ;;  %1995 = vmatprep.subr.bf16.mxu1 %v3441_v31 }
 0x30d   :  { %v913_v50 = vsel %vm849_vm14, %v3075_v3, %v1717_v39  ;;  %v1718_v63 = vadd.f32 -1.0, %v2180_v16  ;;  %1336 = vadd.xlane.f32.xlu1 %v1309_v22  ;;  %1829 = vmatprep.subr.bf16.mxu0 %v3119_v20 }
 0x30e   :  { %v1006_v59 = vmul.f32 %v3443_v38, %v913_v50  ;;  %1830 = vmatpush3.bf16.msra.mxu0 %v3115_v30  ;;  %v1290_v45 = vmul.f32 %v3444_v2, %v913_v50  ;;  %1050 = vadd.xlane.f32.xlu0 %v1024_v12 }
 0x30f   :  { %v914_v52 = vsel %vm850_vm15, %v3083_v35, %v1718_v63 }
 0x310   :  { %v1007_v44 = vmul.f32 %v3443_v38, %v914_v52  ;;  %v1310_v42 = vmul.f32 %v3445_v17, %v1290_v45  ;;  %v1996_v3 = vpack.c.bf16 %v914_v52, %v913_v50  ;;  %v1291_v61 = vmul.f32 %v3444_v2, %v914_v52 }
 0x311   :  { %1052 = vadd.xlane.f32.xlu1 %v1025_v10  ;;  %v1026_v54 = vmul.f32 %v3446_v24, %v1006_v59 }
 0x312   :  { %v2182_v26 = vpop.eup %2181  ;;  %v1311_v19 = vmul.f32 %v3445_v17, %v1291_v61  ;;  %v1556_v21 = vpack.c.bf16 %v1291_v61, %v1290_v45  ;;  %v1272_v18 = vpack.c.bf16 %v1007_v44, %v1006_v59  ;;  %v1027_v23 = vmul.f32 %v3446_v24, %v1007_v44  ;;  %1338 = vadd.xlane.f32.xlu0 %v1310_v42 }
 0x313   :  { %v1719_v56 = vadd.f32 -1.0, %v2182_v26  ;;  %1997 = vmatpush3.bf16.xpose.msra.mxu1 %v1996_v3 }
 0x314   :  { %v2184_v35 = vpop.eup %2183  ;;  %1831 = vmatprep.subr.bf16.mxu0 %v1556_v21  ;;  %1998 = vmatprep.subr.bf16.mxu1 %v3441_v31 }
 0x315   :  { %v915_v36 = vsel %vm851_vm1, %v3100_v49, %v1719_v56  ;;  %v1720_v9 = vadd.f32 -1.0, %v2184_v35  ;;  %1340 = vadd.xlane.f32.xlu1 %v1311_v19  ;;  %1832 = vmatpush3.bf16.msra.mxu0 %v1272_v18 }
 0x316   :  { %v1008_v33 = vmul.f32 %v3443_v38, %v915_v36  ;;  %v1292_v53 = vmul.f32 %v3444_v2, %v915_v36  ;;  %1054 = vadd.xlane.f32.xlu0 %v1026_v54 }
 0x317   :  { %v916_v28 = vsel %vm852_vm2, %v836_v13, %v1720_v9 }
 0x318   :  { %v1009_v62 = vmul.f32 %v3443_v38, %v916_v28  ;;  %v1312_v58 = vmul.f32 %v3445_v17, %v1292_v53  ;;  %v1999_v48 = vpack.c.bf16 %v916_v28, %v915_v36  ;;  %v1293_v4 = vmul.f32 %v3444_v2, %v916_v28  ;;  %v3447_v38 = vld [vmem:[#allocation20_spill] sm:$0xff] }
 0x319   :  { %1056 = vadd.xlane.f32.xlu1 %v1027_v23  ;;  %v1028_v31 = vmul.f32 %v3446_v24, %v1008_v33  ;;  %v918_v14 = vrot.slane %v3447_v38, 2 }
 0x31a   :  { %v1313_v27 = vmul.f32 %v3445_v17, %v1293_v4  ;;  %v1557_v49 = vpack.c.bf16 %v1293_v4, %v1292_v53  ;;  %v1273_v11 = vpack.c.bf16 %v1009_v62, %v1008_v33  ;;  %v1029_v47 = vmul.f32 %v3446_v24, %v1009_v62  ;;  %1342 = vadd.xlane.f32.xlu0 %v1312_v58 }
 0x31b   :  { %2000 = vmatpush3.bf16.xpose.msra.mxu1 %v1999_v48 }
 0x31c   :  { %2001 = vmatprep.subr.bf16.mxu1 %v3001_v8  ;;  %1833 = vmatprep.subr.bf16.mxu0 %v1557_v49 }
 0x31d   :  { %1344 = vadd.xlane.f32.xlu1 %v1313_v27  ;;  %1834 = vmatpush3.bf16.msra.mxu0 %v1273_v11 }
 0x31e   :  { %1058 = vadd.xlane.f32.xlu0 %v1028_v31 }
 0x321   :  { %1060 = vadd.xlane.f32.xlu1 %v1029_v47 }
 0x322   :  { %1951 = vmatmul.mubr.f32.vlgmr.msra.gmra.mrb[32].mxu1 %v918_v14 }
 0x323   :  { %2009 = vmatpush3.bf16.msra.mxu1 %v2997_v6 }
 0x324   :  { %2002 = vmatprep.subr.bf16.mxu1 %v3022_v29 }
 0x327   :  { %2010 = vmatpush3.bf16.msra.mxu1 %v3018_v40 }
 0x328   :  { %2003 = vmatprep.subr.bf16.mxu1 %v3047_v7 }
 0x32b   :  { %2011 = vmatpush3.bf16.msra.mxu1 %v3043_v60 }
 0x32c   :  { %2004 = vmatprep.subr.bf16.mxu1 %v3072_v46 }
 0x32f   :  { %2012 = vmatpush3.bf16.msra.mxu1 %v3068_v41 }
 0x330   :  { %2005 = vmatprep.subr.bf16.mxu1 %v3097_v5 }
 0x333   :  { %2013 = vmatpush3.bf16.msra.mxu1 %v3093_v51 }
 0x334   :  { %2006 = vmatprep.subr.bf16.mxu1 %v3119_v20 }
 0x337   :  { %2014 = vmatpush3.bf16.msra.mxu1 %v3115_v30 }
 0x338   :  { %2007 = vmatprep.subr.bf16.mxu1 %v1556_v21 }
 0x33b   :  { %2015 = vmatpush3.bf16.msra.mxu1 %v1272_v18 }
 0x33c   :  { %2008 = vmatprep.subr.bf16.mxu1 %v1557_v49 }
 0x33f   :  { %2016 = vmatpush3.bf16.msra.mxu1 %v1273_v11 }
 0x36f   :  { %v1315_v17 = vpop.xlane.xlu0 %1314 }
 0x372   :  { %v1317_v2 = vpop.xlane.xlu1 %1316 }
 0x373   :  { %v1031_v6 = vpop.xlane.xlu0 %1030 }
 0x376   :  { %v1033_v24 = vpop.xlane.xlu1 %1032 }
 0x377   :  { %v1319_v40 = vpop.xlane.xlu0 %1318 }
 0x37a   :  { %v1321_v8 = vpop.xlane.xlu1 %1320 }
 0x37b   :  { %v1035_v60 = vpop.xlane.xlu0 %1034 }
 0x37e   :  { %v1037_v29 = vpop.xlane.xlu1 %1036 }
 0x37f   :  { %v3162_v41 = vpop.xlane.xlu0 %1322 }
 0x382   :  { %v3160_v7 = vpop.xlane.xlu1 %1324 }
 0x383   :  { %v3166_v51 = vpop.xlane.xlu0 %1038 }
 0x386   :  { %v3164_v46 = vpop.xlane.xlu1 %1040 }
 0x387   :  { %v3170_v1 = vpop.xlane.xlu0 %1326 }
 0x38a   :  { %v3168_v5 = vpop.xlane.xlu1 %1328 }
 0x38b   :  { %v3180_v15 = vpop.xlane.xlu0 %1042 }
 0x38e   :  { %v3172_v34 = vpop.xlane.xlu1 %1044 }
 0x38f   :  { %v3192_v61 = vpop.xlane.xlu0 %1330 }
 0x392   :  { %v3182_v37 = vpop.xlane.xlu1 %1332 }
 0x393   :  { %v3196_v31 = vpop.xlane.xlu0 %1046 }
 0x396   :  { %v3194_v21 = vpop.xlane.xlu1 %1048 }
 0x39a   :  { %v3198_v47 = vpop.xlane.xlu1 %1336 }
 0x3f5   :  { %v986_v13 = vpop.f32.mrb[32].mxu1 }
 0x3f6   :  { %v3175_v55 = vrot.slane %v986_v13, %v3448_v57  ;;  %v3178_v43 = vrot.slane %v986_v13, %v3449_v32  ;;  %v1952_v25 = vpop.f32.mrb[33].mxu1 }
 0x3f7   :  { %v3208_v25 = vpop.xlane.xlu0 %1334 }
 0x3f8   :  { %v1351_v12 = vadd.f32 %v3178_v43, %v1317_v2  ;;  %v1350_v0 = vadd.f32 %v3178_v43, %v1315_v17  ;;  %v1067_v30 = vadd.f32 %v3175_v55, %v1033_v24  ;;  %v1066_v10 = vadd.f32 %v3175_v55, %v1031_v6 }
 0x3f9   :  { %v1353_v39 = vadd.f32 %v3178_v43, %v1321_v8  ;;  %v1352_v22 = vadd.f32 %v3178_v43, %v1319_v40  ;;  %v1069_v20 = vadd.f32 %v3175_v55, %v1037_v29  ;;  %v1068_v16 = vadd.f32 %v3175_v55, %v1035_v60 }
 0x3fa   :  { %vm1367_vm0 = vcmp.gt.f32.partialorder %v1351_v12, 0.0  ;;  %v1383_v50 = vsub.f32 0.0, %v1351_v12  ;;  %v1399_v63 = vmul.f32 -0.2, %v1351_v12  ;;  %vm1366_vm3 = vcmp.gt.f32.partialorder %v1350_v0, 0.0 }
 0x3fb   :  { %v1382_v59 = vsub.f32 0.0, %v1350_v0  ;;  %v1398_v45 = vmul.f32 -0.2, %v1350_v0  ;;  %vm1083_vm4 = vcmp.gt.f32.partialorder %v1067_v30, 0.0  ;;  %v1099_v52 = vsub.f32 0.0, %v1067_v30 }
 0x3fc   :  { %v1415_v44 = vsel %vm1367_vm0, %v1383_v50, %v1399_v63  ;;  %v1115_v42 = vmul.f32 -0.2, %v1067_v30  ;;  %vm1082_vm5 = vcmp.gt.f32.partialorder %v1066_v10, 0.0  ;;  %v1098_v3 = vsub.f32 0.0, %v1066_v10  ;;  %v3210_v30 = vpop.xlane.xlu1 %1052  ;;  %v2314_v63 = vld [vmem:[#allocation5] sm:$0xff] }
 0x3fd   :  { %v1432_v54 = vmul.f32 1.442695, %v1415_v44  ;;  %v1414_v26 = vsel %vm1366_vm3, %v1382_v59, %v1398_v45  ;;  %v1114_v19 = vmul.f32 -0.2, %v1066_v10  ;;  %vm1369_vm6 = vcmp.gt.f32.partialorder %v1353_v39, 0.0  ;;  %v2313_v10 = vld [vmem:[#allocation5 + $0x8] sm:$0xff] }
 0x3fe   :  { %v1430_v18 = vmul.f32 1.442695, %v1414_v26  ;;  %v1131_v23 = vsel %vm1083_vm4, %v1099_v52, %v1115_v42  ;;  %v1385_v56 = vsub.f32 0.0, %v1353_v39  ;;  %v1401_v35 = vmul.f32 -0.2, %v1353_v39 }
 0x3ff   :  { %2185 = vpow2.f32 %v1432_v54  ;;  %v1148_v36 = vmul.f32 1.442695, %v1131_v23  ;;  %v1130_v9 = vsel %vm1082_vm5, %v1098_v3, %v1114_v19  ;;  %vm1368_vm7 = vcmp.gt.f32.partialorder %v1352_v22, 0.0 }
 0x400   :  { %2187 = vpow2.f32 %v1430_v18  ;;  %v1146_v33 = vmul.f32 1.442695, %v1130_v9  ;;  %v1417_v53 = vsel %vm1369_vm6, %v1385_v56, %v1401_v35  ;;  %v1384_v28 = vsub.f32 0.0, %v1352_v22  ;;  %v3227_v35 = vpop.xlane.xlu0 %1050 }
 0x401   :  { %2189 = vpow2.f32 %v1148_v36  ;;  %v1436_v62 = vmul.f32 1.442695, %v1417_v53  ;;  %v1400_v58 = vmul.f32 -0.2, %v1352_v22  ;;  %vm1085_vm8 = vcmp.gt.f32.partialorder %v1069_v20, 0.0 }
 0x402   :  { %2191 = vpow2.f32 %v1146_v33  ;;  %v1101_v48 = vsub.f32 0.0, %v1069_v20  ;;  %v1117_v4 = vmul.f32 -0.2, %v1069_v20  ;;  %vm1084_vm9 = vcmp.gt.f32.partialorder %v1068_v16, 0.0 }
 0x403   :  { %2193 = vpow2.f32 %v1436_v62  ;;  %v1416_v27 = vsel %vm1368_vm7, %v1384_v28, %v1400_v58  ;;  %v1100_v49 = vsub.f32 0.0, %v1068_v16  ;;  %v1116_v11 = vmul.f32 -0.2, %v1068_v16  ;;  %v1341_v28 = vpop.xlane.xlu1 %1340  ;;  %v2315_v62 = vld [vmem:[#allocation5 + $0x18] sm:$0xff] }
 0x404   :  { %v1434_v38 = vmul.f32 1.442695, %v1416_v27  ;;  %v1133_v14 = vsel %vm1085_vm8, %v1101_v48, %v1117_v4  ;;  %v1355_v2 = vadd.f32 %v3178_v43, %v3160_v7  ;;  %v1354_v17 = vadd.f32 %v3178_v43, %v3162_v41 }
 0x405   :  { %v1152_v24 = vmul.f32 1.442695, %v1133_v14  ;;  %v1132_v6 = vsel %vm1084_vm9, %v1100_v49, %v1116_v11  ;;  %v1071_v8 = vadd.f32 %v3175_v55, %v3164_v46  ;;  %v1070_v40 = vadd.f32 %v3175_v55, %v3166_v51 }
 0x406   :  { %2195 = vpow2.f32 %v1434_v38  ;;  %v1150_v29 = vmul.f32 1.442695, %v1132_v6  ;;  %vm1371_vm10 = vcmp.gt.f32.partialorder %v1355_v2, 0.0  ;;  %v1387_v60 = vsub.f32 0.0, %v1355_v2  ;;  %v2316_v38 = vld [vmem:[#allocation5 + $0x10] sm:$0xff] }
 0x407   :  { %2197 = vpow2.f32 %v1152_v24  ;;  %v1403_v13 = vmul.f32 -0.2, %v1355_v2  ;;  %vm1370_vm11 = vcmp.gt.f32.partialorder %v1354_v17, 0.0  ;;  %v1386_v57 = vsub.f32 0.0, %v1354_v17 }
 0x408   :  { %2199 = vpow2.f32 %v1150_v29  ;;  %v1402_v7 = vmul.f32 -0.2, %v1354_v17  ;;  %vm1087_vm12 = vcmp.gt.f32.partialorder %v1071_v8, 0.0  ;;  %v1103_v41 = vsub.f32 0.0, %v1071_v8 }
 0x409   :  { %v2186_v32 = vpop.eup %2185  ;;  %v1419_v12 = vsel %vm1371_vm10, %v1387_v60, %v1403_v13  ;;  %v1119_v46 = vmul.f32 -0.2, %v1071_v8  ;;  %vm1086_vm13 = vcmp.gt.f32.partialorder %v1070_v40, 0.0  ;;  %v1102_v0 = vsub.f32 0.0, %v1070_v40 }
 0x40a   :  { %v2188_v51 = vpop.eup %2187  ;;  %v3212_v39 = vmul.f32 %v2313_v10, %v2186_v32  ;;  %v1440_v22 = vmul.f32 1.442695, %v1419_v12  ;;  %v1418_v20 = vsel %vm1370_vm11, %v1386_v57, %v1402_v7  ;;  %v1118_v16 = vmul.f32 -0.2, %v1070_v40  ;;  %v1339_v40 = vpop.xlane.xlu0 %1338 }
 0x40b   :  { %v2190_v50 = vpop.eup %2189  ;;  %v3215_v59 = vmul.f32 %v2314_v63, %v2188_v51  ;;  %v1438_v45 = vmul.f32 1.442695, %v1418_v20  ;;  %v1135_v52 = vsel %vm1087_vm12, %v1103_v41, %v1119_v46  ;;  %v1357_v44 = vadd.f32 %v3178_v43, %v3168_v5  ;;  %v2317_v20 = vld [vmem:[#allocation5 + $0x28] sm:$0xff] }
 0x40c   :  { %v2192_v42 = vpop.eup %2191  ;;  %1480 = vadd.xlane.f32.xlu1 %v3212_v39  ;;  %2201 = vpow2.f32 %v1440_v22  ;;  %v1156_v3 = vmul.f32 1.442695, %v1135_v52  ;;  %v1134_v54 = vsel %vm1086_vm13, %v1102_v0, %v1118_v16  ;;  %v3223_v19 = vmul.f32 %v2313_v10, %v2190_v50  ;;  %v2318_v52 = vld [vmem:[#allocation5 + $0x20] sm:$0xff] }
 0x40d   :  { %v2194_v26 = vpop.eup %2193  ;;  %1478 = vadd.xlane.f32.xlu0 %v3215_v59  ;;  %2203 = vpow2.f32 %v1438_v45  ;;  %v1154_v18 = vmul.f32 1.442695, %v1134_v54  ;;  %vm1373_vm14 = vcmp.gt.f32.partialorder %v1357_v44, 0.0  ;;  %v3225_v23 = vmul.f32 %v2314_v63, %v2192_v42 }
 0x40e   :  { %2205 = vpow2.f32 %v1156_v3  ;;  %v1389_v56 = vsub.f32 0.0, %v1357_v44  ;;  %v1405_v5 = vmul.f32 -0.2, %v1357_v44  ;;  %v1356_v36 = vadd.f32 %v3178_v43, %v3170_v1 }
 0x40f   :  { %2207 = vpow2.f32 %v1154_v18  ;;  %v1073_v9 = vadd.f32 %v3175_v55, %v3172_v34  ;;  %v1072_v33 = vadd.f32 %v3175_v55, %v3180_v15  ;;  %v3236_v58 = vmul.f32 %v2315_v62, %v2194_v26  ;;  %v1055_v18 = vpop.xlane.xlu0 %1054 }
 0x410   :  { %v2196_v53 = vpop.eup %2195  ;;  %1196 = vadd.xlane.f32.xlu1 %v3223_v19  ;;  %v1421_v48 = vsel %vm1373_vm14, %v1389_v56, %v1405_v5  ;;  %v1359_v4 = vadd.f32 %v3178_v43, %v3182_v37  ;;  %v1358_v1 = vadd.f32 %v3178_v43, %v3192_v61  ;;  %vm1372_vm15 = vcmp.gt.f32.partialorder %v1356_v36, 0.0  ;;  %v1057_v56 = vpop.xlane.xlu1 %1056 }
 0x411   :  { %v2198_v27 = vpop.eup %2197  ;;  %1194 = vadd.xlane.f32.xlu0 %v3225_v23  ;;  %v1444_v34 = vmul.f32 1.442695, %v1421_v48  ;;  %v1388_v15 = vsub.f32 0.0, %v1356_v36  ;;  %v1363_v49 = vadd.f32 %v3178_v43, %v1341_v28  ;;  %v3244_v14 = vmul.f32 %v2316_v38, %v2196_v53 }
 0x412   :  { %v2200_v11 = vpop.eup %2199  ;;  %v1404_v2 = vmul.f32 -0.2, %v1356_v36  ;;  %vm1089_vm1 = vcmp.gt.f32.partialorder %v1073_v9, 0.0  ;;  %v1105_v17 = vsub.f32 0.0, %v1073_v9  ;;  %v3246_v24 = vmul.f32 %v2315_v62, %v2198_v27 }
 0x413   :  { %2209 = vpow2.f32 %v1444_v34  ;;  %v1121_v37 = vmul.f32 -0.2, %v1073_v9  ;;  %vm1088_vm2 = vcmp.gt.f32.partialorder %v1072_v33, 0.0  ;;  %v1104_v6 = vsub.f32 0.0, %v1072_v33 }
 0x414   :  { %1484 = vadd.xlane.f32.xlu1 %v3236_v58  ;;  %v1420_v61 = vsel %vm1372_vm15, %v1388_v15, %v1404_v2  ;;  %v1120_v8 = vmul.f32 -0.2, %v1072_v33  ;;  %vm1375_vm0 = vcmp.gt.f32.partialorder %v1359_v4, 0.0  ;;  %v1391_v13 = vsub.f32 0.0, %v1359_v4  ;;  %v2319_v15 = vld [vmem:[#allocation5 + $0x38] sm:$0xff] }
 0x415   :  { %1482 = vadd.xlane.f32.xlu0 %v3244_v14  ;;  %v1442_v29 = vmul.f32 1.442695, %v1420_v61  ;;  %v1137_v60 = vsel %vm1089_vm1, %v1105_v17, %v1121_v37  ;;  %v1407_v57 = vmul.f32 -0.2, %v1359_v4  ;;  %v3250_v41 = vmul.f32 %v2316_v38, %v2200_v11 }
 0x416   :  { %v2202_v7 = vpop.eup %2201  ;;  %v1160_v32 = vmul.f32 1.442695, %v1137_v60  ;;  %v1136_v12 = vsel %vm1088_vm2, %v1104_v6, %v1120_v8  ;;  %v1390_v46 = vsub.f32 0.0, %v1358_v1  ;;  %vm1374_vm3 = vcmp.gt.f32.partialorder %v1358_v1, 0.0 }
 0x417   :  { %v2204_v0 = vpop.eup %2203  ;;  %2211 = vpow2.f32 %v1442_v29  ;;  %v1158_v51 = vmul.f32 1.442695, %v1136_v12  ;;  %v1423_v10 = vsel %vm1375_vm0, %v1391_v13, %v1407_v57  ;;  %v3253_v16 = vmul.f32 %v2317_v20, %v2202_v7  ;;  %v2320_v7 = vld [vmem:[#allocation5 + $0x30] sm:$0xff] }
 0x418   :  { %v2206_v22 = vpop.eup %2205  ;;  %1200 = vadd.xlane.f32.xlu1 %v3246_v24  ;;  %2213 = vpow2.f32 %v1160_v32  ;;  %v1448_v50 = vmul.f32 1.442695, %v1423_v10  ;;  %v1406_v63 = vmul.f32 -0.2, %v1358_v1  ;;  %v3256_v44 = vmul.f32 %v2318_v52, %v2204_v0 }
 0x419   :  { %v2208_v45 = vpop.eup %2207  ;;  %1198 = vadd.xlane.f32.xlu0 %v3250_v41  ;;  %2215 = vpow2.f32 %v1158_v51  ;;  %vm1379_vm4 = vcmp.gt.f32.partialorder %v1363_v49, 0.0  ;;  %v1395_v42 = vsub.f32 0.0, %v1363_v49  ;;  %v3258_v3 = vmul.f32 %v2317_v20, %v2206_v22 }
 0x41a   :  { %2217 = vpow2.f32 %v1448_v50  ;;  %v1422_v54 = vsel %vm1374_vm3, %v1390_v46, %v1406_v63  ;;  %v1411_v26 = vmul.f32 -0.2, %v1363_v49  ;;  %v1362_v36 = vadd.f32 %v3178_v43, %v1339_v40  ;;  %v3288_v50 = vld [vmem:[#allocation5 + $0x48] sm:$0xff] }
 0x41b   :  { %v1446_v5 = vmul.f32 1.442695, %v1422_v54  ;;  %v1075_v9 = vadd.f32 %v3175_v55, %v3194_v21  ;;  %v1074_v33 = vadd.f32 %v3175_v55, %v3196_v31  ;;  %v3267_v53 = vmul.f32 %v2318_v52, %v2208_v45  ;;  %v1343_v52 = vpop.xlane.xlu0 %1342 }
 0x41c   :  { %1488 = vadd.xlane.f32.xlu1 %v3253_v16  ;;  %v1427_v28 = vsel %vm1379_vm4, %v1395_v42, %v1411_v26  ;;  %v1079_v62 = vadd.f32 %v3175_v55, %v1057_v56  ;;  %v1078_v48 = vadd.f32 %v3175_v55, %v1055_v18  ;;  %vm1378_vm5 = vcmp.gt.f32.partialorder %v1362_v36, 0.0  ;;  %v1345_v42 = vpop.xlane.xlu1 %1344 }
 0x41d   :  { %v2210_v4 = vpop.eup %2209  ;;  %1486 = vadd.xlane.f32.xlu0 %v3256_v44  ;;  %2219 = vpow2.f32 %v1446_v5  ;;  %v1456_v1 = vmul.f32 1.442695, %v1427_v28  ;;  %v1394_v27 = vsub.f32 0.0, %v1362_v36  ;;  %v1410_v21 = vmul.f32 -0.2, %v1362_v36 }
 0x41e   :  { %vm1091_vm6 = vcmp.gt.f32.partialorder %v1075_v9, 0.0  ;;  %v1107_v34 = vsub.f32 0.0, %v1075_v9  ;;  %v1361_v31 = vadd.f32 %v3178_v43, %v3198_v47  ;;  %v3274_v49 = vmul.f32 %v2319_v15, %v2210_v4 }
 0x41f   :  { %v1123_v11 = vmul.f32 -0.2, %v1075_v9  ;;  %vm1090_vm7 = vcmp.gt.f32.partialorder %v1074_v33, 0.0  ;;  %v1106_v38 = vsub.f32 0.0, %v1074_v33  ;;  %v1426_v2 = vsel %vm1378_vm5, %v1394_v27, %v1410_v21 }
 0x420   :  { %1204 = vadd.xlane.f32.xlu1 %v3258_v3  ;;  %v1122_v17 = vmul.f32 -0.2, %v1074_v33  ;;  %vm1095_vm8 = vcmp.gt.f32.partialorder %v1079_v62, 0.0  ;;  %v1111_v37 = vsub.f32 0.0, %v1079_v62  ;;  %2221 = vpow2.f32 %v1456_v1 }
 0x421   :  { %v2212_v61 = vpop.eup %2211  ;;  %1202 = vadd.xlane.f32.xlu0 %v3267_v53  ;;  %v1454_v6 = vmul.f32 1.442695, %v1426_v2  ;;  %v1139_v8 = vsel %vm1091_vm6, %v1107_v34, %v1123_v11  ;;  %v1127_v47 = vmul.f32 -0.2, %v1079_v62  ;;  %vm1094_vm9 = vcmp.gt.f32.partialorder %v1078_v48, 0.0 }
 0x422   :  { %v2214_v40 = vpop.eup %2213  ;;  %v1164_v29 = vmul.f32 1.442695, %v1139_v8  ;;  %v1138_v60 = vsel %vm1090_vm7, %v1106_v38, %v1122_v17  ;;  %v1110_v13 = vsub.f32 0.0, %v1078_v48  ;;  %v3279_v32 = vmul.f32 %v2320_v7, %v2212_v61  ;;  %v1061_v17 = vpop.xlane.xlu1 %1060 }
 0x423   :  { %v2216_v57 = vpop.eup %2215  ;;  %2223 = vpow2.f32 %v1454_v6  ;;  %v1162_v12 = vmul.f32 1.442695, %v1138_v60  ;;  %v1143_v46 = vsel %vm1095_vm8, %v1111_v37, %v1127_v47  ;;  %v3283_v51 = vmul.f32 %v2319_v15, %v2214_v40  ;;  %v2323_v47 = vld [vmem:[#allocation5 + $0x68] sm:$0xff] }
 0x424   :  { %v2218_v0 = vpop.eup %2217  ;;  %1492 = vadd.xlane.f32.xlu1 %v3274_v49  ;;  %v3285_v10 = vmul.f32 %v2320_v7, %v2216_v57  ;;  %v1172_v22 = vmul.f32 1.442695, %v1143_v46  ;;  %v1126_v20 = vmul.f32 -0.2, %v1078_v48  ;;  %2225 = vpow2.f32 %v1164_v29  ;;  %v2322_v48 = vld [vmem:[#allocation5 + $0x40] sm:$0xff] }
 0x425   :  { %1490 = vadd.xlane.f32.xlu0 %v3279_v32  ;;  %v3291_v63 = vmul.f32 %v3288_v50, %v2218_v0  ;;  %vm1377_vm10 = vcmp.gt.f32.partialorder %v1361_v31, 0.0  ;;  %v1393_v45 = vsub.f32 0.0, %v1361_v31  ;;  %2227 = vpow2.f32 %v1162_v12  ;;  %v2324_v57 = vld [vmem:[#allocation5 + $0x60] sm:$0xff] }
 0x426   :  { %v1142_v54 = vsel %vm1094_vm9, %v1110_v13, %v1126_v20  ;;  %v1409_v26 = vmul.f32 -0.2, %v1361_v31  ;;  %v1360_v18 = vadd.f32 %v3178_v43, %v3208_v25  ;;  %2229 = vpow2.f32 %v1172_v22  ;;  %v1059_v22 = vpop.xlane.xlu0 %1058 }
 0x427   :  { %v2220_v56 = vpop.eup %2219  ;;  %v1170_v5 = vmul.f32 1.442695, %v1142_v54  ;;  %v1365_v36 = vadd.f32 %v3178_v43, %v1345_v42  ;;  %v1364_v9 = vadd.f32 %v3178_v43, %v1343_v52  ;;  %v1077_v62 = vadd.f32 %v3175_v55, %v3210_v30 }
 0x428   :  { %1208 = vadd.xlane.f32.xlu1 %v3283_v51  ;;  %v1425_v33 = vsel %vm1377_vm10, %v1393_v45, %v1409_v26  ;;  %vm1376_vm11 = vcmp.gt.f32.partialorder %v1360_v18, 0.0  ;;  %v1392_v28 = vsub.f32 0.0, %v1360_v18  ;;  %v3302_v4 = vmul.f32 %v2322_v48, %v2220_v56 }
 0x429   :  { %1206 = vadd.xlane.f32.xlu0 %v3285_v10  ;;  %v1452_v25 = vmul.f32 1.442695, %v1425_v33  ;;  %v1408_v1 = vmul.f32 -0.2, %v1360_v18  ;;  %vm1381_vm12 = vcmp.gt.f32.partialorder %v1365_v36, 0.0  ;;  %2231 = vpow2.f32 %v1170_v5 }
 0x42a   :  { %v1397_v27 = vsub.f32 0.0, %v1365_v36  ;;  %v1413_v21 = vmul.f32 -0.2, %v1365_v36  ;;  %vm1380_vm13 = vcmp.gt.f32.partialorder %v1364_v9, 0.0  ;;  %v2222_v43 = vpop.eup %2221  ;;  %v1396_v31 = vsub.f32 0.0, %v1364_v9 }
 0x42b   :  { %2233 = vpow2.f32 %v1452_v25  ;;  %v1424_v34 = vsel %vm1376_vm11, %v1392_v28, %v1408_v1  ;;  %v1412_v15 = vmul.f32 -0.2, %v1364_v9  ;;  %vm1093_vm14 = vcmp.gt.f32.partialorder %v1077_v62, 0.0 }
 0x42c   :  { %1496 = vadd.xlane.f32.xlu1 %v3291_v63  ;;  %v1450_v30 = vmul.f32 1.442695, %v1424_v34  ;;  %v1429_v11 = vsel %vm1381_vm12, %v1397_v27, %v1413_v21  ;;  %v1109_v38 = vsub.f32 0.0, %v1077_v62  ;;  %v1125_v6 = vmul.f32 -0.2, %v1077_v62 }
 0x42d   :  { %v2224_v2 = vpop.eup %2223  ;;  %1494 = vadd.xlane.f32.xlu0 %v3302_v4  ;;  %v1460_v37 = vmul.f32 1.442695, %v1429_v11  ;;  %v1428_v61 = vsel %vm1380_vm13, %v1396_v31, %v1412_v15  ;;  %v1076_v8 = vadd.f32 %v3175_v55, %v3227_v35  ;;  %v3308_v40 = vmul.f32 %v2323_v47, %v2222_v43  ;;  %v2325_v43 = vld [vmem:[#allocation5 + $0x58] sm:$0xff]  ;;  %v2326_v31 = vld [vmem:[#allocation5 + $0x50] sm:$0xff] }
 0x42e   :  { %2235 = vpow2.f32 %v1450_v30  ;;  %v1458_v29 = vmul.f32 1.442695, %v1428_v61  ;;  %v1081_v60 = vadd.f32 %v3175_v55, %v1061_v17  ;;  %v2226_v13 = vpop.eup %2225  ;;  %v3311_v7 = vmul.f32 %v2324_v57, %v2224_v2  ;;  %v2327_v11 = vld [vmem:[#allocation5 + $0x78] sm:$0xff]  ;;  %v2328_v17 = vld [vmem:[#allocation5 + $0x70] sm:$0xff] }
 0x42f   :  { %v1141_v12 = vsel %vm1093_vm14, %v1109_v38, %v1125_v6  ;;  %v2228_v46 = vpop.eup %2227  ;;  %2237 = vpow2.f32 %v1460_v37  ;;  %vm1092_vm15 = vcmp.gt.f32.partialorder %v1076_v8, 0.0  ;;  %v1108_v0 = vsub.f32 0.0, %v1076_v8 }
 0x430   :  { %1504 = vadd.xlane.f32.xlu1 %v3308_v40  ;;  %v2230_v35 = vpop.eup %2229  ;;  %v1168_v20 = vmul.f32 1.442695, %v1141_v12  ;;  %v1124_v45 = vmul.f32 -0.2, %v1076_v8  ;;  %vm1097_vm1 = vcmp.gt.f32.partialorder %v1081_v60, 0.0  ;;  %v1113_v52 = vsub.f32 0.0, %v1081_v60 }
 0x431   :  { %1502 = vadd.xlane.f32.xlu0 %v3311_v7  ;;  %v3317_v42 = vmul.f32 %v3288_v50, %v2226_v13  ;;  %2239 = vpow2.f32 %v1458_v29  ;;  %v1129_v54 = vmul.f32 -0.2, %v1081_v60  ;;  %v1080_v26 = vadd.f32 %v3175_v55, %v1059_v22 }
 0x432   :  { %v3320_v18 = vmul.f32 %v2322_v48, %v2228_v46  ;;  %v1140_v56 = vsel %vm1092_vm15, %v1108_v0, %v1124_v45  ;;  %2241 = vpow2.f32 %v1168_v20  ;;  %v3324_v25 = vmul.f32 %v2323_v47, %v2230_v35 }
 0x433   :  { %v2232_v5 = vpop.eup %2231  ;;  %v1166_v36 = vmul.f32 1.442695, %v1140_v56  ;;  %v1145_v9 = vsel %vm1097_vm1, %v1113_v52, %v1129_v54  ;;  %vm1096_vm2 = vcmp.gt.f32.partialorder %v1080_v26, 0.0  ;;  %v1112_v50 = vsub.f32 0.0, %v1080_v26 }
 0x434   :  { %1212 = vadd.xlane.f32.xlu1 %v3317_v42  ;;  %v1176_v28 = vmul.f32 1.442695, %v1145_v9  ;;  %v1128_v62 = vmul.f32 -0.2, %v1080_v26  ;;  %v3326_v55 = vmul.f32 %v2324_v57, %v2232_v5 }
 0x435   :  { %v2234_v33 = vpop.eup %2233  ;;  %1210 = vadd.xlane.f32.xlu0 %v3320_v18  ;;  %2243 = vpow2.f32 %v1166_v36 }
 0x436   :  { %v1144_v48 = vsel %vm1096_vm2, %v1112_v50, %v1128_v62  ;;  %2245 = vpow2.f32 %v1176_v28  ;;  %v3330_v34 = vmul.f32 %v2325_v43, %v2234_v33 }
 0x437   :  { %v1174_v27 = vmul.f32 1.442695, %v1144_v48 }
 0x438   :  { %v2236_v1 = vpop.eup %2235  ;;  %1220 = vadd.xlane.f32.xlu1 %v3324_v25 }
 0x439   :  { %1218 = vadd.xlane.f32.xlu0 %v3326_v55  ;;  %v2238_v21 = vpop.eup %2237  ;;  %2247 = vpow2.f32 %v1174_v27  ;;  %v3332_v15 = vmul.f32 %v2326_v31, %v2236_v1 }
 0x43a   :  { %v3336_v38 = vmul.f32 %v2327_v11, %v2238_v21 }
 0x43b   :  { %v2240_v30 = vpop.eup %2239 }
 0x43c   :  { %1500 = vadd.xlane.f32.xlu1 %v3330_v34  ;;  %v2242_v2 = vpop.eup %2241  ;;  %v3338_v37 = vmul.f32 %v2328_v17, %v2240_v30 }
 0x43d   :  { %1498 = vadd.xlane.f32.xlu0 %v3332_v15  ;;  %v3342_v6 = vmul.f32 %v2325_v43, %v2242_v2 }
 0x43f   :  { %v2244_v61 = vpop.eup %2243 }
 0x440   :  { %1508 = vadd.xlane.f32.xlu1 %v3336_v38  ;;  %v2246_v8 = vpop.eup %2245  ;;  %v3344_v47 = vmul.f32 %v2326_v31, %v2244_v61 }
 0x441   :  { %1506 = vadd.xlane.f32.xlu0 %v3338_v37  ;;  %v3348_v60 = vmul.f32 %v2327_v11, %v2246_v8 }
 0x443   :  { %v2248_v29 = vpop.eup %2247 }
 0x444   :  { %1216 = vadd.xlane.f32.xlu1 %v3342_v6  ;;  %v3350_v13 = vmul.f32 %v2328_v17, %v2248_v29 }
 0x445   :  { %1214 = vadd.xlane.f32.xlu0 %v3344_v47 }
 0x448   :  { %1224 = vadd.xlane.f32.xlu1 %v3348_v60 }
 0x449   :  { %1222 = vadd.xlane.f32.xlu0 %v3350_v13 }
 0x499   :  { %v1481_v57 = vpop.xlane.xlu1 %1480 }
 0x49a   :  { %2249 = vrcp.f32 %v1481_v57  ;;  %v1479_v12 = vpop.xlane.xlu0 %1478 }
 0x49b   :  { %2251 = vrcp.f32 %v1479_v12 }
 0x49d   :  { %v1197_v46 = vpop.xlane.xlu1 %1196 }
 0x49e   :  { %2253 = vrcp.f32 %v1197_v46  ;;  %v1195_v0 = vpop.xlane.xlu0 %1194 }
 0x49f   :  { %2255 = vrcp.f32 %v1195_v0 }
 0x4a1   :  { %v1485_v35 = vpop.xlane.xlu1 %1484 }
 0x4a2   :  { %2257 = vrcp.f32 %v1485_v35  ;;  %v1483_v22 = vpop.xlane.xlu0 %1482 }
 0x4a3   :  { %2259 = vrcp.f32 %v1483_v22 }
 0x4a4   :  { %v2250_v20 = vpop.eup %2249 }
 0x4a5   :  { %v2252_v45 = vpop.eup %2251  ;;  %v1201_v52 = vpop.xlane.xlu1 %1200  ;;  %v1527_v54 = vmul.f32 %v2250_v20, %v3212_v39 }
 0x4a6   :  { %2261 = vrcp.f32 %v1201_v52  ;;  %v1199_v26 = vpop.xlane.xlu0 %1198  ;;  %v1526_v56 = vmul.f32 %v2252_v45, %v3215_v59 }
 0x4a7   :  { %2263 = vrcp.f32 %v1199_v26 }
 0x4a8   :  { %v2254_v5 = vpop.eup %2253  ;;  %v1542_v36 = vpack.c.bf16 %v1527_v54, %v1526_v56 }
 0x4a9   :  { %v2256_v9 = vpop.eup %2255  ;;  %v1489_v33 = vpop.xlane.xlu1 %1488  ;;  %v1243_v28 = vmul.f32 %v2254_v5, %v3223_v19 }
 0x4aa   :  { %2265 = vrcp.f32 %v1489_v33  ;;  %1590 = vmatprep.mubr.bf16.mxu0 %v1542_v36  ;;  %v1487_v50 = vpop.xlane.xlu0 %1486  ;;  %v1242_v62 = vmul.f32 %v2256_v9, %v3225_v23 }
 0x4ab   :  { %2267 = vrcp.f32 %v1487_v50 }
 0x4ac   :  { %v2258_v48 = vpop.eup %2257  ;;  %v1258_v1 = vpack.c.bf16 %v1243_v28, %v1242_v62 }
 0x4ad   :  { %v2260_v39 = vpop.eup %2259  ;;  %v1205_v27 = vpop.xlane.xlu1 %1204  ;;  %v1529_v21 = vmul.f32 %v2258_v48, %v3236_v58 }
 0x4ae   :  { %2269 = vrcp.f32 %v1205_v27  ;;  %1591 = vmatmul.mubr.bf16.vlgmr.msra.gmra.mrb[4].mxu0 %v1258_v1  ;;  %v1203_v59 = vpop.xlane.xlu0 %1202  ;;  %v1528_v43 = vmul.f32 %v2260_v39, %v3244_v14 }
 0x4af   :  { %2271 = vrcp.f32 %v1203_v59 }
 0x4b0   :  { %v2262_v31 = vpop.eup %2261  ;;  %v1543_v19 = vpack.c.bf16 %v1529_v21, %v1528_v43 }
 0x4b1   :  { %v2264_v30 = vpop.eup %2263  ;;  %v1493_v11 = vpop.xlane.xlu1 %1492  ;;  %v1245_v2 = vmul.f32 %v2262_v31, %v3246_v24 }
 0x4b2   :  { %2273 = vrcp.f32 %v1493_v11  ;;  %1598 = vmatprep.mubr.bf16.mxu0 %v1543_v19  ;;  %v1491_v23 = vpop.xlane.xlu0 %1490  ;;  %v1244_v17 = vmul.f32 %v2264_v30, %v3250_v41 }
 0x4b3   :  { %2275 = vrcp.f32 %v1491_v23 }
 0x4b4   :  { %v2266_v61 = vpop.eup %2265  ;;  %v1259_v58 = vpack.c.bf16 %v1245_v2, %v1244_v17 }
 0x4b5   :  { %v2268_v8 = vpop.eup %2267  ;;  %v1209_v29 = vpop.xlane.xlu1 %1208  ;;  %v1531_v57 = vmul.f32 %v2266_v61, %v3253_v16 }
 0x4b6   :  { %2277 = vrcp.f32 %v1209_v29  ;;  %1599 = vmatmul.mubr.bf16.gmra.mrb[8].mxu0 %v1259_v58  ;;  %v1207_v14 = vpop.xlane.xlu0 %1206  ;;  %v1530_v12 = vmul.f32 %v2268_v8, %v3256_v44 }
 0x4b7   :  { %2279 = vrcp.f32 %v1207_v14 }
 0x4b8   :  { %v2270_v46 = vpop.eup %2269  ;;  %v1544_v24 = vpack.c.bf16 %v1531_v57, %v1530_v12 }
 0x4b9   :  { %v2272_v0 = vpop.eup %2271  ;;  %v1497_v35 = vpop.xlane.xlu1 %1496  ;;  %v1247_v22 = vmul.f32 %v2270_v46, %v3258_v3 }
 0x4ba   :  { %2281 = vrcp.f32 %v1497_v35  ;;  %1606 = vmatprep.mubr.bf16.mxu0 %v1544_v24  ;;  %v1495_v41 = vpop.xlane.xlu0 %1494  ;;  %v1246_v20 = vmul.f32 %v2272_v0, %v3267_v53 }
 0x4bb   :  { %2283 = vrcp.f32 %v1495_v41 }
 0x4bc   :  { %v2274_v45 = vpop.eup %2273  ;;  %v1260_v16 = vpack.c.bf16 %v1247_v22, %v1246_v20 }
 0x4bd   :  { %v2276_v52 = vpop.eup %2275  ;;  %v1505_v54 = vpop.xlane.xlu1 %1504  ;;  %v1533_v26 = vmul.f32 %v2274_v45, %v3274_v49 }
 0x4be   :  { %2285 = vrcp.f32 %v1505_v54  ;;  %1607 = vmatmul.mubr.bf16.gmra.mrb[12].mxu0 %v1260_v16  ;;  %v1503_v44 = vpop.xlane.xlu0 %1502  ;;  %v1532_v56 = vmul.f32 %v2276_v52, %v3279_v32 }
 0x4bf   :  { %2287 = vrcp.f32 %v1503_v44 }
 0x4c0   :  { %v2278_v5 = vpop.eup %2277  ;;  %v1545_v3 = vpack.c.bf16 %v1533_v26, %v1532_v56 }
 0x4c1   :  { %v2280_v36 = vpop.eup %2279  ;;  %v1213_v9 = vpop.xlane.xlu1 %1212  ;;  %v1249_v33 = vmul.f32 %v2278_v5, %v3283_v51 }
 0x4c2   :  { %2289 = vrcp.f32 %v1213_v9  ;;  %1614 = vmatprep.mubr.bf16.mxu0 %v1545_v3  ;;  %v1211_v53 = vpop.xlane.xlu0 %1210  ;;  %v1248_v28 = vmul.f32 %v2280_v36, %v3285_v10 }
 0x4c3   :  { %2291 = vrcp.f32 %v1211_v53 }
 0x4c4   :  { %v2282_v50 = vpop.eup %2281  ;;  %v1261_v49 = vpack.c.bf16 %v1249_v33, %v1248_v28 }
 0x4c5   :  { %v2284_v62 = vpop.eup %2283  ;;  %v1221_v48 = vpop.xlane.xlu1 %1220  ;;  %v1535_v1 = vmul.f32 %v2282_v50, %v3291_v63 }
 0x4c6   :  { %2293 = vrcp.f32 %v1221_v48  ;;  %1615 = vmatmul.mubr.bf16.gmra.mrb[16].mxu0 %v1261_v49  ;;  %v1219_v32 = vpop.xlane.xlu0 %1218  ;;  %v1534_v39 = vmul.f32 %v2284_v62, %v3302_v4 }
 0x4c7   :  { %2295 = vrcp.f32 %v1219_v32 }
 0x4c8   :  { %v2286_v27 = vpop.eup %2285  ;;  %v1546_v51 = vpack.c.bf16 %v1535_v1, %v1534_v39 }
 0x4c9   :  { %v2288_v21 = vpop.eup %2287  ;;  %v1501_v59 = vpop.xlane.xlu1 %1500  ;;  %v1539_v43 = vmul.f32 %v2286_v27, %v3308_v40 }
 0x4ca   :  { %2297 = vrcp.f32 %v1501_v59  ;;  %1622 = vmatprep.mubr.bf16.mxu0 %v1546_v51  ;;  %v1499_v10 = vpop.xlane.xlu0 %1498  ;;  %v1538_v31 = vmul.f32 %v2288_v21, %v3311_v7 }
 0x4cb   :  { %2299 = vrcp.f32 %v1499_v10 }
 0x4cc   :  { %v2290_v19 = vpop.eup %2289  ;;  %v1548_v63 = vpack.c.bf16 %v1539_v43, %v1538_v31 }
 0x4cd   :  { %v2292_v30 = vpop.eup %2291  ;;  %v1509_v11 = vpop.xlane.xlu1 %1508  ;;  %v1251_v2 = vmul.f32 %v2290_v19, %v3317_v42 }
 0x4ce   :  { %2301 = vrcp.f32 %v1509_v11  ;;  %1638 = vmatprep.mubr.bf16.mxu1 %v1548_v63  ;;  %v1507_v4 = vpop.xlane.xlu0 %1506  ;;  %v1250_v23 = vmul.f32 %v2292_v30, %v3320_v18 }
 0x4cf   :  { %2303 = vrcp.f32 %v1507_v4 }
 0x4d0   :  { %v2294_v17 = vpop.eup %2293  ;;  %v1262_v40 = vpack.c.bf16 %v1251_v2, %v1250_v23 }
 0x4d1   :  { %v2296_v61 = vpop.eup %2295  ;;  %v1217_v58 = vpop.xlane.xlu1 %1216  ;;  %v1255_v8 = vmul.f32 %v2294_v17, %v3324_v25 }
 0x4d2   :  { %2305 = vrcp.f32 %v1217_v58  ;;  %1623 = vmatmul.mubr.bf16.gmra.mrb[20].mxu0 %v1262_v40  ;;  %v1215_v7 = vpop.xlane.xlu0 %1214  ;;  %v1254_v29 = vmul.f32 %v2296_v61, %v3326_v55 }
 0x4d3   :  { %2307 = vrcp.f32 %v1215_v7 }
 0x4d4   :  { %v2298_v57 = vpop.eup %2297  ;;  %v1264_v42 = vpack.c.bf16 %v1255_v8, %v1254_v29 }
 0x4d5   :  { %v2300_v14 = vpop.eup %2299  ;;  %v1225_v12 = vpop.xlane.xlu1 %1224  ;;  %v1537_v46 = vmul.f32 %v2298_v57, %v3330_v34 }
 0x4d6   :  { %2309 = vrcp.f32 %v1225_v12  ;;  %1639 = vmatmul.mubr.bf16.vlgmr.msra.gmra.mrb[36].mxu1 %v1264_v42  ;;  %v1223_v18 = vpop.xlane.xlu0 %1222  ;;  %v1536_v24 = vmul.f32 %v2300_v14, %v3332_v15 }
 0x4d7   :  { %2311 = vrcp.f32 %v1223_v18 }
 0x4d8   :  { %v2302_v0 = vpop.eup %2301  ;;  %v1547_v25 = vpack.c.bf16 %v1537_v46, %v1536_v24 }
 0x4d9   :  { %v2304_v35 = vpop.eup %2303  ;;  %v1541_v22 = vmul.f32 %v2302_v0, %v3336_v38 }
 0x4da   :  { %1630 = vmatprep.mubr.bf16.mxu0 %v1547_v25  ;;  %v1540_v55 = vmul.f32 %v2304_v35, %v3338_v37 }
 0x4dc   :  { %v2306_v41 = vpop.eup %2305  ;;  %v1549_v20 = vpack.c.bf16 %v1541_v22, %v1540_v55 }
 0x4dd   :  { %v2308_v45 = vpop.eup %2307  ;;  %v1253_v16 = vmul.f32 %v2306_v41, %v3342_v6 }
 0x4de   :  { %1646 = vmatprep.mubr.bf16.mxu1 %v1549_v20  ;;  %v1252_v34 = vmul.f32 %v2308_v45, %v3344_v47 }
 0x4e0   :  { %v2310_v52 = vpop.eup %2309  ;;  %v1263_v54 = vpack.c.bf16 %v1253_v16, %v1252_v34 }
 0x4e1   :  { %v2312_v15 = vpop.eup %2311  ;;  %v1257_v26 = vmul.f32 %v2310_v52, %v3348_v60 }
 0x4e2   :  { %1631 = vmatmul.mubr.bf16.gmra.mrb[24].mxu0 %v1263_v54  ;;  %v1256_v44 = vmul.f32 %v2312_v15, %v3350_v13 }
 0x4e4   :  { %v1265_v38 = vpack.c.bf16 %v1257_v26, %v1256_v44 }
 0x4e6   :  { %1647 = vmatmul.mubr.bf16.gmra.mrb[40].mxu1 %v1265_v38 }
 0x581   :  { %v1835_v56 = vpop.f32.mrb[4].mxu0 }
 0x582   :  { %v1836_v37 = vpop.f32.mrb[5].mxu0 }
 0x583   :  { %v1837_v5 = vadd.f32 %v1836_v37, %v1835_v56  ;;  %v1838_v3 = vpop.f32.mrb[6].mxu0 }
 0x584   :  { %v1839_v36 = vpop.f32.mrb[7].mxu0 }
 0x585   :  { %v1655_v9 = vmul.f32 0.5, %v1837_v5  ;;  %v1840_v6 = vadd.f32 %v1839_v36, %v1838_v3 }
 0x587   :  { %1671 = vst [vmem:[#allocation7] sm:$0xff] %v1655_v9  ;;  %v1656_v33 = vmul.f32 0.5, %v1840_v6 }
 0x589   :  { %1672 = vst [vmem:[#allocation7 + $0x8] sm:$0xff] %v1656_v33  ;;  %v1841_v47 = vpop.f32.mrb[8].mxu0 }
 0x58a   :  { %v1842_v53 = vpop.f32.mrb[9].mxu0 }
 0x58b   :  { %v1843_v28 = vadd.f32 %v1842_v53, %v1841_v47  ;;  %v1844_v50 = vpop.f32.mrb[10].mxu0 }
 0x58c   :  { %v1845_v60 = vpop.f32.mrb[11].mxu0 }
 0x58d   :  { %v1657_v49 = vmul.f32 0.5, %v1843_v28  ;;  %v1846_v62 = vadd.f32 %v1845_v60, %v1844_v50 }
 0x58f   :  { %1673 = vst [vmem:[#allocation7 + $0x10] sm:$0xff] %v1657_v49  ;;  %v1658_v13 = vmul.f32 0.5, %v1846_v62 }
 0x591   :  { %1674 = vst [vmem:[#allocation7 + $0x18] sm:$0xff] %v1658_v13  ;;  %v1847_v48 = vpop.f32.mrb[12].mxu0 }
 0x592   :  { %v1848_v1 = vpop.f32.mrb[13].mxu0 }
 0x593   :  { %v1849_v32 = vadd.f32 %v1848_v1, %v1847_v48  ;;  %v1850_v39 = vpop.f32.mrb[14].mxu0 }
 0x594   :  { %v1851_v27 = vpop.f32.mrb[15].mxu0 }
 0x595   :  { %v1659_v51 = vmul.f32 0.5, %v1849_v32  ;;  %v1852_v21 = vadd.f32 %v1851_v27, %v1850_v39 }
 0x597   :  { %1675 = vst [vmem:[#allocation7 + $0x20] sm:$0xff] %v1659_v51  ;;  %v1660_v59 = vmul.f32 0.5, %v1852_v21 }
 0x599   :  { %1676 = vst [vmem:[#allocation7 + $0x28] sm:$0xff] %v1660_v59  ;;  %v1853_v43 = vpop.f32.mrb[16].mxu0 }
 0x59a   :  { %v1854_v10 = vpop.f32.mrb[17].mxu0 }
 0x59b   :  { %v1855_v31 = vadd.f32 %v1854_v10, %v1853_v43  ;;  %v1856_v19 = vpop.f32.mrb[18].mxu0 }
 0x59c   :  { %v1857_v63 = vpop.f32.mrb[19].mxu0 }
 0x59d   :  { %v1661_v30 = vmul.f32 0.5, %v1855_v31  ;;  %v1858_v11 = vadd.f32 %v1857_v63, %v1856_v19 }
 0x59f   :  { %1677 = vst [vmem:[#allocation7 + $0x30] sm:$0xff] %v1661_v30  ;;  %v1662_v2 = vmul.f32 0.5, %v1858_v11 }
 0x5a1   :  { %1678 = vst [vmem:[#allocation7 + $0x38] sm:$0xff] %v1662_v2 }
 0x5a5   :  { %v1859_v4 = vpop.f32.mrb[20].mxu0 }
 0x5a6   :  { %v1860_v23 = vpop.f32.mrb[21].mxu0 }
 0x5a7   :  { %v1861_v17 = vadd.f32 %v1860_v23, %v1859_v4  ;;  %v1862_v40 = vpop.f32.mrb[22].mxu0 }
 0x5a8   :  { %v1863_v61 = vpop.f32.mrb[23].mxu0 }
 0x5a9   :  { %v1663_v58 = vmul.f32 0.5, %v1861_v17  ;;  %v1864_v8 = vadd.f32 %v1863_v61, %v1862_v40  ;;  %v1871_v7 = vpop.f32.mrb[36].mxu1 }
 0x5aa   :  { %v1872_v29 = vpop.f32.mrb[37].mxu1 }
 0x5ab   :  { %1679 = vst [vmem:[#allocation7 + $0x40] sm:$0xff] %v1663_v58  ;;  %v1664_v57 = vmul.f32 0.5, %v1864_v8  ;;  %v1873_v42 = vadd.f32 %v1872_v29, %v1871_v7  ;;  %v1874_v14 = vpop.f32.mrb[38].mxu1 }
 0x5ac   :  { %v1875_v12 = vpop.f32.mrb[39].mxu1 }
 0x5ad   :  { %1680 = vst [vmem:[#allocation7 + $0x48] sm:$0xff] %v1664_v57  ;;  %v1667_v46 = vmul.f32 0.5, %v1873_v42  ;;  %v1876_v18 = vadd.f32 %v1875_v12, %v1874_v14 }
 0x5af   :  { %1683 = vst [vmem:[#allocation7 + $0x60] sm:$0xff] %v1667_v46  ;;  %v1668_v24 = vmul.f32 0.5, %v1876_v18 }
 0x5b1   :  { %1684 = vst [vmem:[#allocation7 + $0x68] sm:$0xff] %v1668_v24 }
 0x5b5   :  { %v1865_v0 = vpop.f32.mrb[24].mxu0 }
 0x5b6   :  { %v1866_v25 = vpop.f32.mrb[25].mxu0 }
 0x5b7   :  { %v1867_v35 = vadd.f32 %v1866_v25, %v1865_v0  ;;  %v1868_v22 = vpop.f32.mrb[26].mxu0 }
 0x5b8   :  { %v1869_v55 = vpop.f32.mrb[27].mxu0 }
 0x5b9   :  { %v1665_v41 = vmul.f32 0.5, %v1867_v35  ;;  %v1870_v20 = vadd.f32 %v1869_v55, %v1868_v22  ;;  %v1877_v45 = vpop.f32.mrb[40].mxu1 }
 0x5ba   :  { %v1878_v16 = vpop.f32.mrb[41].mxu1 }
 0x5bb   :  { %1681 = vst [vmem:[#allocation7 + $0x50] sm:$0xff] %v1665_v41  ;;  %v1666_v34 = vmul.f32 0.5, %v1870_v20  ;;  %v1879_v52 = vadd.f32 %v1878_v16, %v1877_v45  ;;  %v1880_v54 = vpop.f32.mrb[42].mxu1 }
 0x5bc   :  { %v1881_v15 = vpop.f32.mrb[43].mxu1 }
 0x5bd   :  { %1682 = vst [vmem:[#allocation7 + $0x58] sm:$0xff] %v1666_v34  ;;  %v1669_v26 = vmul.f32 0.5, %v1879_v52  ;;  %v1882_v44 = vadd.f32 %v1881_v15, %v1880_v54 }
 0x5bf   :  { %1685 = vst [vmem:[#allocation7 + $0x70] sm:$0xff] %v1669_v26  ;;  %v1670_v38 = vmul.f32 0.5, %v1882_v44 }
 0x5c1   :  { %1686 = vst [vmem:[#allocation7 + $0x78] sm:$0xff] %v1670_v38 }
 0x5c2   :  { %2384 = shalt.err (!%p2381_p6)
}
 0x5c3   :  { %s2385_s25 = scalar_lea.hbm %s3406_s5, 2048 }
 0x5c4   :  { %p2386_p7 = scmp.ne.s32.totalorder %s3406_s5, %s2385_s25  ;;  %p2389_p8 = scmp.lt.u32.totalorder %s2385_s25, %s3406_s5 }
 0x5c6   :  { %p2391_p9 = pnand %p2389_p8, %p2386_p7 }
 0x5c8   :  { %2394 = shalt.err (!%p2391_p9)
}
 0x5c9   :  { %1698 = dma.vmem_to_hbm [thread:$0]  %s1693_s21, 2048, %s3406_s5, [#allocation4], %s2402_s28, %s2402_s28, %s2403_s29  }
 0x5ca   :  { %2399 = dma.done.wait [#allocation4], 2048  }
 0x5cb   :  { %2400 = vsyncadd [#allocation4], 4294965248 }
 0x5cc   :  { %1702 = vsyncpa [#allocation3], 1 }
 0x5cd   :  { %1703 = vsyncpa [#allocation6], 1 }
 0x5ce   :  { %1704 = vsyncpa [#allocation4], 1 }

</bundles_post_ra>
